<compile_context>
chip_gen: v6e
topology: v6e:2x2x1
jax: 0.10.0
libtpu: 0.0.40
codegen_flags: <defaults>
</compile_context>

<pallas_src>
import math

import jax
import jax.numpy as jnp
from jax import lax
from jax.experimental import pallas as pl
from jax.experimental.pallas import tpu as pltpu

_EPS = 1e-5  # nn.BatchNorm2d default


def _make_dense_block_kernel(N, H, W, C0, G, L):
    """Kernel factory closing over all static shapes of the block."""
    HW = H * W
    NHW = N * HW
    chans = [C0 + l * G for l in range(L)]  # per-layer input channel count

    def kernel(*refs):
        x_ref = refs[0]     # (C0, N*H*W)        flattened, batch folded in lanes
        out_ref = refs[-1]  # (C0 + L*G, N*H*W)  doubles as the growing activation
        layer_refs = [refs[1 + 3 * l: 4 + 3 * l] for l in range(L)]

        # Seed the output with the block input: realizes torch.cat([x, ...]).
        out_ref[0:C0, :] = x_ref[...]

        # Channel-invariant spatial boundary masks, one (1, N*H*W) row each.
        # p is the per-image flat pixel index, so the same masks also kill the
        # wrap-around between the N images folded into the lane axis.
        lane = lax.broadcasted_iota(jnp.int32, (1, NHW), 1)
        p = lane % HW
        col = p % W
        not_top = (p >= W).astype(jnp.float32)            # reading h-1 is valid
        not_bot = (p < (H - 1) * W).astype(jnp.float32)   # reading h+1 is valid
        not_left = (col > 0).astype(jnp.float32)          # reading w-1 is valid
        not_right = (col < (W - 1)).astype(jnp.float32)   # reading w+1 is valid

        tap_shift, tap_mask = [], []
        for dy in range(3):
            for dx in range(3):
                oy, ox = dy - 1, dx - 1
                m = None
                if oy == -1:
                    m = not_top
                elif oy == 1:
                    m = not_bot
                if ox == -1:
                    m = not_left if m is None else m * not_left
                elif ox == 1:
                    m = not_right if m is None else m * not_right
                tap_shift.append(oy * W + ox)
                tap_mask.append(m)

        for l in range(L):
            cin = chans[l]
            g_ref, b_ref, w_ref = layer_refs[l]

            a = out_ref[0:cin, :]  # (cin, N*H*W) — all previously produced channels

            # Training-mode BatchNorm2d: biased batch stats over (N, H, W),
            # i.e. the lane axis of this layout.  Computed entirely in VMEM.
            mean = jnp.mean(a, axis=1, keepdims=True)
            cen = a - mean
            var = jnp.mean(cen * cen, axis=1, keepdims=True)
            scale = g_ref[...] * lax.rsqrt(var + _EPS)          # (cin, 1)
            act = jnp.maximum(cen * scale + b_ref[...], 0.0)    # BN + ReLU, f32 VPU

            # 3x3 SAME conv: per tap, channel contraction on the MXU first,
            # then spatial shift (XLU roll) + boundary mask (VPU) on the small
            # (G, N*H*W) result (shift/mask commute with a channel contraction).
            # TODO(synk): on v6e/v7x cast `act`/weights to bfloat16 at the MXU
            # boundary (keep f32 accumulation) to halve VMEM/HBM traffic.
            conv = jnp.zeros((G, NHW), jnp.float32)
            for t in range(9):
                z = jnp.dot(w_ref[t], act, preferred_element_type=jnp.float32)
                k = tap_shift[t]
                if k != 0:
                    z = pltpu.roll(z, shift=(-k) % NHW, axis=1)
                if tap_mask[t] is not None:
                    z = z * tap_mask[t]
                conv = conv + z

            # Dense concat: write this layer's output at its channel offset.
            out_ref[cin:cin + G, :] = conv.astype(out_ref.dtype)

    return kernel


def _prep_weight(w_hwio):
    """(3, 3, Cin, G) HWIO -> (9, G, Cin), tap index t = dy*3 + dx."""
    kh, kw, cin, g = w_hwio.shape
    return jnp.transpose(w_hwio, (0, 1, 3, 2)).reshape(kh * kw, g, cin)


@jax.jit
def dense_block_apply(x_nchw, params):
    """DenseBlock forward. x_nchw: (N, C, H, W) -> (N, C + L*growth, H, W)."""
    N, C0, H, W = x_nchw.shape
    L = len(params)
    G = params[0][2].shape[-1]
    chans = [C0 + l * G for l in range(L)]
    c_total = C0 + L * G
    NHW = N * H * W

    # Fold the batch into the lane axis: (N, C, H, W) -> (C, N*H*W).
    xf = jnp.transpose(x_nchw, (1, 0, 2, 3)).reshape(C0, NHW)

    inputs = [xf]
    in_specs = [pl.BlockSpec((C0, NHW), lambda i: (0, 0))]
    for (gamma, beta, w), c in zip(params, chans):
        inputs += [gamma.reshape(c, 1), beta.reshape(c, 1), _prep_weight(w)]
        in_specs += [
            pl.BlockSpec((c, 1), lambda i: (0, 0)),
            pl.BlockSpec((c, 1), lambda i: (0, 0)),
            pl.BlockSpec((9, G, c), lambda i: (0, 0, 0)),
        ]

    # TODO(synk): at realistic DenseNet sizes, tile N*H*W along the lane axis
    # with a +/-W halo (tile width a multiple of 128), make that a "parallel"
    # grid axis (feeds v7x's 2 TensorCores, restores DMA/compute pipelining)
    # and set vmem_limit_bytes explicitly; pad Cin/Cout to multiples of 8.
    out = pl.pallas_call(
        _make_dense_block_kernel(N, H, W, C0, G, L),
        out_shape=jax.ShapeDtypeStruct((c_total, NHW), x_nchw.dtype),
        grid=(1,),
        in_specs=in_specs,
        out_specs=pl.BlockSpec((c_total, NHW), lambda i: (0, 0)),
        compiler_params=pltpu.CompilerParams(
            dimension_semantics=("arbitrary",)),
    )(*inputs)

    return jnp.transpose(out.reshape(c_total, N, H, W), (1, 0, 2, 3))


def init_dense_block_params(key, in_channels, growth_rate, num_layers):
    """Deterministic parameter init matching the PyTorch module's shapes."""
    params = []
    c = in_channels
    for _ in range(num_layers):
        key, k1, k2, k3 = jax.random.split(key, 4)
        gamma = 1.0 + 0.1 * jax.random.normal(k1, (c,), jnp.float32)
        beta = 0.1 * jax.random.normal(k2, (c,), jnp.float32)
        fan_in = c * 9
        w = jax.random.normal(k3, (3, 3, c, growth_rate), jnp.float32) / math.sqrt(fan_in)
        params.append((gamma, beta, w))
        c += growth_rate
    return params, c


def dense_block_reference(x, params):
    """Pure-JAX reference (same math, lax conv, NCHW) for correctness check."""
    for gamma, beta, w in params:
        mean = jnp.mean(x, axis=(0, 2, 3), keepdims=True)
        var = jnp.mean((x - mean) ** 2, axis=(0, 2, 3), keepdims=True)
        g = gamma.reshape(1, -1, 1, 1)
        b = beta.reshape(1, -1, 1, 1)
        act = jnp.maximum((x - mean) / jnp.sqrt(var + _EPS) * g + b, 0.0)
        out = lax.conv_general_dilated(
            act, w, window_strides=(1, 1), padding="SAME",
            dimension_numbers=("NCHW", "HWIO", "NCHW"))
        x = jnp.concatenate([x, out], axis=1)
    return x


if __name__ == "__main__":
    batch, in_channels, spatial = 2, 4, 16
    growth_rate, num_layers = 4, 3

    key = jax.random.PRNGKey(0)
    key, kx = jax.random.split(key)
    x = jax.random.normal(kx, (batch, in_channels, spatial, spatial), jnp.float32)

    params, out_channels = init_dense_block_params(
        key, in_channels, growth_rate, num_layers)

    y = jax.block_until_ready(dense_block_apply(x, params))
    assert y.shape == (batch, out_channels, spatial, spatial), y.shape

    y_ref = jax.block_until_ready(dense_block_reference(x, params))
    assert jnp.allclose(y, y_ref, atol=1e-4, rtol=1e-4), (
        float(jnp.max(jnp.abs(y - y_ref))))

    print("KERNEL_OK")
</pallas_src>

<mosaic_0001>
module attributes {stable_mosaic.version = 11 : i64} {
  func.func @kernel(%arg0: i32, %arg1: memref<4x512xf32, #tpu.memory_space<vmem>>, %arg2: memref<4x1xf32, #tpu.memory_space<vmem>>, %arg3: memref<4x1xf32, #tpu.memory_space<vmem>>, %arg4: memref<9x4x4xf32, #tpu.memory_space<vmem>>, %arg5: memref<8x1xf32, #tpu.memory_space<vmem>>, %arg6: memref<8x1xf32, #tpu.memory_space<vmem>>, %arg7: memref<9x4x8xf32, #tpu.memory_space<vmem>>, %arg8: memref<12x1xf32, #tpu.memory_space<vmem>>, %arg9: memref<12x1xf32, #tpu.memory_space<vmem>>, %arg10: memref<9x4x12xf32, #tpu.memory_space<vmem>>, %arg11: memref<16x512xf32, #tpu.memory_space<vmem>>) attributes {dimension_semantics = [#tpu.dimension_semantics<arbitrary>], iteration_bounds = array<i64: 1>, scalar_prefetch = 0 : i64, scratch_operands = 0 : i64, tpu.core_type = #tpu.core_type<tc>, window_params = [{pipeline_mode = #tpu.pipeline_mode<synchronous>, transform_indices = @transform_0, window_bounds = array<i64: 4, 512>}, {pipeline_mode = #tpu.pipeline_mode<synchronous>, transform_indices = @transform_1, window_bounds = array<i64: 4, 1>}, {pipeline_mode = #tpu.pipeline_mode<synchronous>, transform_indices = @transform_2, window_bounds = array<i64: 4, 1>}, {pipeline_mode = #tpu.pipeline_mode<synchronous>, transform_indices = @transform_3, window_bounds = array<i64: 9, 4, 4>}, {pipeline_mode = #tpu.pipeline_mode<synchronous>, transform_indices = @transform_4, window_bounds = array<i64: 8, 1>}, {pipeline_mode = #tpu.pipeline_mode<synchronous>, transform_indices = @transform_5, window_bounds = array<i64: 8, 1>}, {pipeline_mode = #tpu.pipeline_mode<synchronous>, transform_indices = @transform_6, window_bounds = array<i64: 9, 4, 8>}, {pipeline_mode = #tpu.pipeline_mode<synchronous>, transform_indices = @transform_7, window_bounds = array<i64: 12, 1>}, {pipeline_mode = #tpu.pipeline_mode<synchronous>, transform_indices = @transform_8, window_bounds = array<i64: 12, 1>}, {pipeline_mode = #tpu.pipeline_mode<synchronous>, transform_indices = @transform_9, window_bounds = array<i64: 9, 4, 12>}, {pipeline_mode = #tpu.pipeline_mode<synchronous>, transform_indices = @transform_10, window_bounds = array<i64: 16, 512>}]} {
    %c0 = arith.constant 0 : index
    %c0_0 = arith.constant 0 : index
    %0 = vector.load %arg1[%c0, %c0_0] : memref<4x512xf32, #tpu.memory_space<vmem>>, vector<4x512xf32>
    %c0_1 = arith.constant 0 : index
    %c0_2 = arith.constant 0 : index
    %1 = vector.load %arg11[%c0_1, %c0_2] : memref<16x512xf32, #tpu.memory_space<vmem>>, vector<4x512xf32>
    tpu.vector_store %arg11[%c0_1, %c0_2], %0 {strides = array<i32>} : memref<16x512xf32, #tpu.memory_space<vmem>>, vector<4x512xf32>,
    %2 = tpu.iota {dimensions = array<i32: 1>} : vector<1x512xi32>
    %c256_i32 = arith.constant 256 : i32
    %c0_i32 = arith.constant 0 : i32
    %3 = arith.cmpi eq, %c256_i32, %c0_i32 : i32
    %c1_i32 = arith.constant 1 : i32
    %4 = arith.select %3, %c1_i32, %c256_i32 : i32
    %5 = vector.broadcast %4 : i32 to vector<1x512xi32>
    %6 = arith.remsi %2, %5 : vector<1x512xi32>
    %c0_i32_3 = arith.constant 0 : i32
    %7 = vector.broadcast %c0_i32_3 : i32 to vector<1x512xi32>
    %8 = arith.cmpi ne, %6, %7 : vector<1x512xi32>
    %c0_i32_4 = arith.constant 0 : i32
    %9 = vector.broadcast %c0_i32_4 : i32 to vector<1x512xi32>
    %10 = arith.cmpi slt, %6, %9 : vector<1x512xi32>
    %c0_i32_5 = arith.constant 0 : i32
    %11 = arith.cmpi slt, %4, %c0_i32_5 : i32
    %12 = vector.broadcast %11 : i1 to vector<1x512xi1>
    %13 = vector.broadcast %12 : vector<1x512xi1> to vector<1x512xi1>
    %14 = arith.xori %10, %13 : vector<1x512xi1>
    %15 = arith.andi %14, %8 : vector<1x512xi1>
    %16 = vector.broadcast %4 : i32 to vector<1x512xi32>
    %17 = arith.addi %6, %16 : vector<1x512xi32>
    %18 = arith.select %15, %17, %6 : vector<1x512xi1>, vector<1x512xi32>
    %c16_i32 = arith.constant 16 : i32
    %c0_i32_6 = arith.constant 0 : i32
    %19 = arith.cmpi eq, %c16_i32, %c0_i32_6 : i32
    %c1_i32_7 = arith.constant 1 : i32
    %20 = arith.select %19, %c1_i32_7, %c16_i32 : i32
    %21 = vector.broadcast %20 : i32 to vector<1x512xi32>
    %22 = arith.remsi %18, %21 : vector<1x512xi32>
    %c0_i32_8 = arith.constant 0 : i32
    %23 = vector.broadcast %c0_i32_8 : i32 to vector<1x512xi32>
    %24 = arith.cmpi ne, %22, %23 : vector<1x512xi32>
    %c0_i32_9 = arith.constant 0 : i32
    %25 = vector.broadcast %c0_i32_9 : i32 to vector<1x512xi32>
    %26 = arith.cmpi slt, %22, %25 : vector<1x512xi32>
    %c0_i32_10 = arith.constant 0 : i32
    %27 = arith.cmpi slt, %20, %c0_i32_10 : i32
    %28 = vector.broadcast %27 : i1 to vector<1x512xi1>
    %29 = vector.broadcast %28 : vector<1x512xi1> to vector<1x512xi1>
    %30 = arith.xori %26, %29 : vector<1x512xi1>
    %31 = arith.andi %30, %24 : vector<1x512xi1>
    %32 = vector.broadcast %20 : i32 to vector<1x512xi32>
    %33 = arith.addi %22, %32 : vector<1x512xi32>
    %34 = arith.select %31, %33, %22 : vector<1x512xi1>, vector<1x512xi32>
    %c16_i32_11 = arith.constant 16 : i32
    %35 = vector.broadcast %c16_i32_11 : i32 to vector<1x512xi32>
    %36 = arith.cmpi sge, %18, %35 : vector<1x512xi32>
    %37 = arith.extui %36 : vector<1x512xi1> to vector<1x512xi32>
    %38 = arith.sitofp %37 : vector<1x512xi32> to vector<1x512xf32>
    %c240_i32 = arith.constant 240 : i32
    %39 = vector.broadcast %c240_i32 : i32 to vector<1x512xi32>
    %40 = arith.cmpi slt, %18, %39 : vector<1x512xi32>
    %41 = arith.extui %40 : vector<1x512xi1> to vector<1x512xi32>
    %42 = arith.sitofp %41 : vector<1x512xi32> to vector<1x512xf32>
    %c0_i32_12 = arith.constant 0 : i32
    %43 = vector.broadcast %c0_i32_12 : i32 to vector<1x512xi32>
    %44 = arith.cmpi sgt, %34, %43 : vector<1x512xi32>
    %45 = arith.extui %44 : vector<1x512xi1> to vector<1x512xi32>
    %46 = arith.sitofp %45 : vector<1x512xi32> to vector<1x512xf32>
    %c15_i32 = arith.constant 15 : i32
    %47 = vector.broadcast %c15_i32 : i32 to vector<1x512xi32>
    %48 = arith.cmpi slt, %34, %47 : vector<1x512xi32>
    %49 = arith.extui %48 : vector<1x512xi1> to vector<1x512xi32>
    %50 = arith.sitofp %49 : vector<1x512xi32> to vector<1x512xf32>
    %51 = arith.mulf %38, %46 : vector<1x512xf32>
    %52 = arith.mulf %38, %50 : vector<1x512xf32>
    %53 = arith.mulf %42, %46 : vector<1x512xf32>
    %54 = arith.mulf %42, %50 : vector<1x512xf32>
    %c0_13 = arith.constant 0 : index
    %c0_14 = arith.constant 0 : index
    %55 = vector.load %arg11[%c0_13, %c0_14] : memref<16x512xf32, #tpu.memory_space<vmem>>, vector<4x512xf32>
    %cst = arith.constant dense<0.000000e+00> : vector<4xf32>
    %56 = vector.multi_reduction <add>, %55, %cst [1] : vector<4x512xf32> to vector<4xf32>
    %57 = vector.shape_cast %56 : vector<4xf32> to vector<4x1xf32>
    %cst_15 = arith.constant 5.120000e+02 : f32
    %58 = vector.broadcast %cst_15 : f32 to vector<4x1xf32>
    %59 = arith.divf %57, %58 : vector<4x1xf32>
    %60 = vector.broadcast %59 : vector<4x1xf32> to vector<4x512xf32>
    %61 = arith.subf %55, %60 : vector<4x512xf32>
    %62 = arith.mulf %61, %61 : vector<4x512xf32>
    %cst_16 = arith.constant dense<0.000000e+00> : vector<4xf32>
    %63 = vector.multi_reduction <add>, %62, %cst_16 [1] : vector<4x512xf32> to vector<4xf32>
    %64 = vector.shape_cast %63 : vector<4xf32> to vector<4x1xf32>
    %cst_17 = arith.constant 5.120000e+02 : f32
    %65 = vector.broadcast %cst_17 : f32 to vector<4x1xf32>
    %66 = arith.divf %64, %65 : vector<4x1xf32>
    %c0_18 = arith.constant 0 : index
    %c0_19 = arith.constant 0 : index
    %67 = vector.load %arg2[%c0_18, %c0_19] : memref<4x1xf32, #tpu.memory_space<vmem>>, vector<4x1xf32>
    %cst_20 = arith.constant 9.99999974E-6 : f32
    %68 = vector.broadcast %cst_20 : f32 to vector<4x1xf32>
    %69 = arith.addf %66, %68 : vector<4x1xf32>
    %70 = math.rsqrt %69 : vector<4x1xf32>
    %71 = arith.mulf %67, %70 : vector<4x1xf32>
    %72 = vector.broadcast %71 : vector<4x1xf32> to vector<4x512xf32>
    %73 = arith.mulf %61, %72 : vector<4x512xf32>
    %c0_21 = arith.constant 0 : index
    %c0_22 = arith.constant 0 : index
    %74 = vector.load %arg3[%c0_21, %c0_22] : memref<4x1xf32, #tpu.memory_space<vmem>>, vector<4x1xf32>
    %75 = vector.broadcast %74 : vector<4x1xf32> to vector<4x512xf32>
    %76 = arith.addf %73, %75 : vector<4x512xf32>
    %cst_23 = arith.constant 0.000000e+00 : f32
    %77 = vector.broadcast %cst_23 : f32 to vector<4x512xf32>
    %78 = arith.maximumf %76, %77 : vector<4x512xf32>
    %cst_24 = arith.constant 0.000000e+00 : f32
    %79 = vector.broadcast %cst_24 : f32 to vector<4x512xf32>
    %c0_25 = arith.constant 0 : index
    %c0_26 = arith.constant 0 : index
    %c0_27 = arith.constant 0 : index
    %80 = vector.load %arg4[%c0_25, %c0_26, %c0_27] : memref<9x4x4xf32, #tpu.memory_space<vmem>>, vector<1x4x4xf32>
    %81 = vector.shape_cast %80 : vector<1x4x4xf32> to vector<4x4xf32>
    %cst_28 = arith.constant dense<0.000000e+00> : vector<4x512xf32>
    %82 = tpu.matmul %81, %78, %cst_28 {dimension_numbers = #tpu.dot_dimension_numbers<[1], [0], [0], [1], [0, 0, 1, 1], [], []>} : vector<4x4xf32>, vector<4x512xf32>, vector<4x512xf32> -> vector<4x512xf32>
    %c17_i32 = arith.constant 17 : i32
    %83 = tpu.dynamic_rotate %82 by %c17_i32 dim 1 : vector<4x512xf32>, i32 -> vector<4x512xf32>
    %84 = vector.broadcast %51 : vector<1x512xf32> to vector<4x512xf32>
    %85 = arith.mulf %83, %84 : vector<4x512xf32>
    %86 = arith.addf %79, %85 : vector<4x512xf32>
    %c1 = arith.constant 1 : index
    %c0_29 = arith.constant 0 : index
    %c0_30 = arith.constant 0 : index
    %87 = vector.load %arg4[%c1, %c0_29, %c0_30] : memref<9x4x4xf32, #tpu.memory_space<vmem>>, vector<1x4x4xf32>
    %88 = vector.shape_cast %87 : vector<1x4x4xf32> to vector<4x4xf32>
    %cst_31 = arith.constant dense<0.000000e+00> : vector<4x512xf32>
    %89 = tpu.matmul %88, %78, %cst_31 {dimension_numbers = #tpu.dot_dimension_numbers<[1], [0], [0], [1], [0, 0, 1, 1], [], []>} : vector<4x4xf32>, vector<4x512xf32>, vector<4x512xf32> -> vector<4x512xf32>
    %c16_i32_32 = arith.constant 16 : i32
    %90 = tpu.dynamic_rotate %89 by %c16_i32_32 dim 1 : vector<4x512xf32>, i32 -> vector<4x512xf32>
    %91 = vector.broadcast %38 : vector<1x512xf32> to vector<4x512xf32>
    %92 = arith.mulf %90, %91 : vector<4x512xf32>
    %93 = arith.addf %86, %92 : vector<4x512xf32>
    %c2 = arith.constant 2 : index
    %c0_33 = arith.constant 0 : index
    %c0_34 = arith.constant 0 : index
    %94 = vector.load %arg4[%c2, %c0_33, %c0_34] : memref<9x4x4xf32, #tpu.memory_space<vmem>>, vector<1x4x4xf32>
    %95 = vector.shape_cast %94 : vector<1x4x4xf32> to vector<4x4xf32>
    %cst_35 = arith.constant dense<0.000000e+00> : vector<4x512xf32>
    %96 = tpu.matmul %95, %78, %cst_35 {dimension_numbers = #tpu.dot_dimension_numbers<[1], [0], [0], [1], [0, 0, 1, 1], [], []>} : vector<4x4xf32>, vector<4x512xf32>, vector<4x512xf32> -> vector<4x512xf32>
    %c15_i32_36 = arith.constant 15 : i32
    %97 = tpu.dynamic_rotate %96 by %c15_i32_36 dim 1 : vector<4x512xf32>, i32 -> vector<4x512xf32>
    %98 = vector.broadcast %52 : vector<1x512xf32> to vector<4x512xf32>
    %99 = arith.mulf %97, %98 : vector<4x512xf32>
    %100 = arith.addf %93, %99 : vector<4x512xf32>
    %c3 = arith.constant 3 : index
    %c0_37 = arith.constant 0 : index
    %c0_38 = arith.constant 0 : index
    %101 = vector.load %arg4[%c3, %c0_37, %c0_38] : memref<9x4x4xf32, #tpu.memory_space<vmem>>, vector<1x4x4xf32>
    %102 = vector.shape_cast %101 : vector<1x4x4xf32> to vector<4x4xf32>
    %cst_39 = arith.constant dense<0.000000e+00> : vector<4x512xf32>
    %103 = tpu.matmul %102, %78, %cst_39 {dimension_numbers = #tpu.dot_dimension_numbers<[1], [0], [0], [1], [0, 0, 1, 1], [], []>} : vector<4x4xf32>, vector<4x512xf32>, vector<4x512xf32> -> vector<4x512xf32>
    %c1_i32_40 = arith.constant 1 : i32
    %104 = tpu.dynamic_rotate %103 by %c1_i32_40 dim 1 : vector<4x512xf32>, i32 -> vector<4x512xf32>
    %105 = vector.broadcast %46 : vector<1x512xf32> to vector<4x512xf32>
    %106 = arith.mulf %104, %105 : vector<4x512xf32>
    %107 = arith.addf %100, %106 : vector<4x512xf32>
    %c4 = arith.constant 4 : index
    %c0_41 = arith.constant 0 : index
    %c0_42 = arith.constant 0 : index
    %108 = vector.load %arg4[%c4, %c0_41, %c0_42] : memref<9x4x4xf32, #tpu.memory_space<vmem>>, vector<1x4x4xf32>
    %109 = vector.shape_cast %108 : vector<1x4x4xf32> to vector<4x4xf32>
    %cst_43 = arith.constant dense<0.000000e+00> : vector<4x512xf32>
    %110 = tpu.matmul %109, %78, %cst_43 {dimension_numbers = #tpu.dot_dimension_numbers<[1], [0], [0], [1], [0, 0, 1, 1], [], []>} : vector<4x4xf32>, vector<4x512xf32>, vector<4x512xf32> -> vector<4x512xf32>
    %111 = arith.addf %107, %110 : vector<4x512xf32>
    %c5 = arith.constant 5 : index
    %c0_44 = arith.constant 0 : index
    %c0_45 = arith.constant 0 : index
    %112 = vector.load %arg4[%c5, %c0_44, %c0_45] : memref<9x4x4xf32, #tpu.memory_space<vmem>>, vector<1x4x4xf32>
    %113 = vector.shape_cast %112 : vector<1x4x4xf32> to vector<4x4xf32>
    %cst_46 = arith.constant dense<0.000000e+00> : vector<4x512xf32>
    %114 = tpu.matmul %113, %78, %cst_46 {dimension_numbers = #tpu.dot_dimension_numbers<[1], [0], [0], [1], [0, 0, 1, 1], [], []>} : vector<4x4xf32>, vector<4x512xf32>, vector<4x512xf32> -> vector<4x512xf32>
    %c511_i32 = arith.constant 511 : i32
    %115 = tpu.dynamic_rotate %114 by %c511_i32 dim 1 : vector<4x512xf32>, i32 -> vector<4x512xf32>
    %116 = vector.broadcast %50 : vector<1x512xf32> to vector<4x512xf32>
    %117 = arith.mulf %115, %116 : vector<4x512xf32>
    %118 = arith.addf %111, %117 : vector<4x512xf32>
    %c6 = arith.constant 6 : index
    %c0_47 = arith.constant 0 : index
    %c0_48 = arith.constant 0 : index
    %119 = vector.load %arg4[%c6, %c0_47, %c0_48] : memref<9x4x4xf32, #tpu.memory_space<vmem>>, vector<1x4x4xf32>
    %120 = vector.shape_cast %119 : vector<1x4x4xf32> to vector<4x4xf32>
    %cst_49 = arith.constant dense<0.000000e+00> : vector<4x512xf32>
    %121 = tpu.matmul %120, %78, %cst_49 {dimension_numbers = #tpu.dot_dimension_numbers<[1], [0], [0], [1], [0, 0, 1, 1], [], []>} : vector<4x4xf32>, vector<4x512xf32>, vector<4x512xf32> -> vector<4x512xf32>
    %c497_i32 = arith.constant 497 : i32
    %122 = tpu.dynamic_rotate %121 by %c497_i32 dim 1 : vector<4x512xf32>, i32 -> vector<4x512xf32>
    %123 = vector.broadcast %53 : vector<1x512xf32> to vector<4x512xf32>
    %124 = arith.mulf %122, %123 : vector<4x512xf32>
    %125 = arith.addf %118, %124 : vector<4x512xf32>
    %c7 = arith.constant 7 : index
    %c0_50 = arith.constant 0 : index
    %c0_51 = arith.constant 0 : index
    %126 = vector.load %arg4[%c7, %c0_50, %c0_51] : memref<9x4x4xf32, #tpu.memory_space<vmem>>, vector<1x4x4xf32>
    %127 = vector.shape_cast %126 : vector<1x4x4xf32> to vector<4x4xf32>
    %cst_52 = arith.constant dense<0.000000e+00> : vector<4x512xf32>
    %128 = tpu.matmul %127, %78, %cst_52 {dimension_numbers = #tpu.dot_dimension_numbers<[1], [0], [0], [1], [0, 0, 1, 1], [], []>} : vector<4x4xf32>, vector<4x512xf32>, vector<4x512xf32> -> vector<4x512xf32>
    %c496_i32 = arith.constant 496 : i32
    %129 = tpu.dynamic_rotate %128 by %c496_i32 dim 1 : vector<4x512xf32>, i32 -> vector<4x512xf32>
    %130 = vector.broadcast %42 : vector<1x512xf32> to vector<4x512xf32>
    %131 = arith.mulf %129, %130 : vector<4x512xf32>
    %132 = arith.addf %125, %131 : vector<4x512xf32>
    %c8 = arith.constant 8 : index
    %c0_53 = arith.constant 0 : index
    %c0_54 = arith.constant 0 : index
    %133 = vector.load %arg4[%c8, %c0_53, %c0_54] : memref<9x4x4xf32, #tpu.memory_space<vmem>>, vector<1x4x4xf32>
    %134 = vector.shape_cast %133 : vector<1x4x4xf32> to vector<4x4xf32>
    %cst_55 = arith.constant dense<0.000000e+00> : vector<4x512xf32>
    %135 = tpu.matmul %134, %78, %cst_55 {dimension_numbers = #tpu.dot_dimension_numbers<[1], [0], [0], [1], [0, 0, 1, 1], [], []>} : vector<4x4xf32>, vector<4x512xf32>, vector<4x512xf32> -> vector<4x512xf32>
    %c495_i32 = arith.constant 495 : i32
    %136 = tpu.dynamic_rotate %135 by %c495_i32 dim 1 : vector<4x512xf32>, i32 -> vector<4x512xf32>
    %137 = vector.broadcast %54 : vector<1x512xf32> to vector<4x512xf32>
    %138 = arith.mulf %136, %137 : vector<4x512xf32>
    %139 = arith.addf %132, %138 : vector<4x512xf32>
    %c4_56 = arith.constant 4 : index
    %c0_57 = arith.constant 0 : index
    %140 = vector.load %arg11[%c4_56, %c0_57] : memref<16x512xf32, #tpu.memory_space<vmem>>, vector<4x512xf32>
    tpu.vector_store %arg11[%c4_56, %c0_57], %139 {strides = array<i32>} : memref<16x512xf32, #tpu.memory_space<vmem>>, vector<4x512xf32>,
    %c0_58 = arith.constant 0 : index
    %c0_59 = arith.constant 0 : index
    %141 = vector.load %arg11[%c0_58, %c0_59] : memref<16x512xf32, #tpu.memory_space<vmem>>, vector<8x512xf32>
    %cst_60 = arith.constant dense<0.000000e+00> : vector<8xf32>
    %142 = vector.multi_reduction <add>, %141, %cst_60 [1] : vector<8x512xf32> to vector<8xf32>
    %143 = vector.shape_cast %142 : vector<8xf32> to vector<8x1xf32>
    %cst_61 = arith.constant 5.120000e+02 : f32
    %144 = vector.broadcast %cst_61 : f32 to vector<8x1xf32>
    %145 = arith.divf %143, %144 : vector<8x1xf32>
    %146 = vector.broadcast %145 : vector<8x1xf32> to vector<8x512xf32>
    %147 = arith.subf %141, %146 : vector<8x512xf32>
    %148 = arith.mulf %147, %147 : vector<8x512xf32>
    %cst_62 = arith.constant dense<0.000000e+00> : vector<8xf32>
    %149 = vector.multi_reduction <add>, %148, %cst_62 [1] : vector<8x512xf32> to vector<8xf32>
    %150 = vector.shape_cast %149 : vector<8xf32> to vector<8x1xf32>
    %cst_63 = arith.constant 5.120000e+02 : f32
    %151 = vector.broadcast %cst_63 : f32 to vector<8x1xf32>
    %152 = arith.divf %150, %151 : vector<8x1xf32>
    %c0_64 = arith.constant 0 : index
    %c0_65 = arith.constant 0 : index
    %153 = vector.load %arg5[%c0_64, %c0_65] : memref<8x1xf32, #tpu.memory_space<vmem>>, vector<8x1xf32>
    %cst_66 = arith.constant 9.99999974E-6 : f32
    %154 = vector.broadcast %cst_66 : f32 to vector<8x1xf32>
    %155 = arith.addf %152, %154 : vector<8x1xf32>
    %156 = math.rsqrt %155 : vector<8x1xf32>
    %157 = arith.mulf %153, %156 : vector<8x1xf32>
    %158 = vector.broadcast %157 : vector<8x1xf32> to vector<8x512xf32>
    %159 = arith.mulf %147, %158 : vector<8x512xf32>
    %c0_67 = arith.constant 0 : index
    %c0_68 = arith.constant 0 : index
    %160 = vector.load %arg6[%c0_67, %c0_68] : memref<8x1xf32, #tpu.memory_space<vmem>>, vector<8x1xf32>
    %161 = vector.broadcast %160 : vector<8x1xf32> to vector<8x512xf32>
    %162 = arith.addf %159, %161 : vector<8x512xf32>
    %cst_69 = arith.constant 0.000000e+00 : f32
    %163 = vector.broadcast %cst_69 : f32 to vector<8x512xf32>
    %164 = arith.maximumf %162, %163 : vector<8x512xf32>
    %cst_70 = arith.constant 0.000000e+00 : f32
    %165 = vector.broadcast %cst_70 : f32 to vector<4x512xf32>
    %c0_71 = arith.constant 0 : index
    %c0_72 = arith.constant 0 : index
    %c0_73 = arith.constant 0 : index
    %166 = vector.load %arg7[%c0_71, %c0_72, %c0_73] : memref<9x4x8xf32, #tpu.memory_space<vmem>>, vector<1x4x8xf32>
    %167 = vector.shape_cast %166 : vector<1x4x8xf32> to vector<4x8xf32>
    %cst_74 = arith.constant dense<0.000000e+00> : vector<4x512xf32>
    %168 = tpu.matmul %167, %164, %cst_74 {dimension_numbers = #tpu.dot_dimension_numbers<[1], [0], [0], [1], [0, 0, 1, 1], [], []>} : vector<4x8xf32>, vector<8x512xf32>, vector<4x512xf32> -> vector<4x512xf32>
    %c17_i32_75 = arith.constant 17 : i32
    %169 = tpu.dynamic_rotate %168 by %c17_i32_75 dim 1 : vector<4x512xf32>, i32 -> vector<4x512xf32>
    %170 = vector.broadcast %51 : vector<1x512xf32> to vector<4x512xf32>
    %171 = arith.mulf %169, %170 : vector<4x512xf32>
    %172 = arith.addf %165, %171 : vector<4x512xf32>
    %c1_76 = arith.constant 1 : index
    %c0_77 = arith.constant 0 : index
    %c0_78 = arith.constant 0 : index
    %173 = vector.load %arg7[%c1_76, %c0_77, %c0_78] : memref<9x4x8xf32, #tpu.memory_space<vmem>>, vector<1x4x8xf32>
    %174 = vector.shape_cast %173 : vector<1x4x8xf32> to vector<4x8xf32>
    %cst_79 = arith.constant dense<0.000000e+00> : vector<4x512xf32>
    %175 = tpu.matmul %174, %164, %cst_79 {dimension_numbers = #tpu.dot_dimension_numbers<[1], [0], [0], [1], [0, 0, 1, 1], [], []>} : vector<4x8xf32>, vector<8x512xf32>, vector<4x512xf32> -> vector<4x512xf32>
    %c16_i32_80 = arith.constant 16 : i32
    %176 = tpu.dynamic_rotate %175 by %c16_i32_80 dim 1 : vector<4x512xf32>, i32 -> vector<4x512xf32>
    %177 = vector.broadcast %38 : vector<1x512xf32> to vector<4x512xf32>
    %178 = arith.mulf %176, %177 : vector<4x512xf32>
    %179 = arith.addf %172, %178 : vector<4x512xf32>
    %c2_81 = arith.constant 2 : index
    %c0_82 = arith.constant 0 : index
    %c0_83 = arith.constant 0 : index
    %180 = vector.load %arg7[%c2_81, %c0_82, %c0_83] : memref<9x4x8xf32, #tpu.memory_space<vmem>>, vector<1x4x8xf32>
    %181 = vector.shape_cast %180 : vector<1x4x8xf32> to vector<4x8xf32>
    %cst_84 = arith.constant dense<0.000000e+00> : vector<4x512xf32>
    %182 = tpu.matmul %181, %164, %cst_84 {dimension_numbers = #tpu.dot_dimension_numbers<[1], [0], [0], [1], [0, 0, 1, 1], [], []>} : vector<4x8xf32>, vector<8x512xf32>, vector<4x512xf32> -> vector<4x512xf32>
    %c15_i32_85 = arith.constant 15 : i32
    %183 = tpu.dynamic_rotate %182 by %c15_i32_85 dim 1 : vector<4x512xf32>, i32 -> vector<4x512xf32>
    %184 = vector.broadcast %52 : vector<1x512xf32> to vector<4x512xf32>
    %185 = arith.mulf %183, %184 : vector<4x512xf32>
    %186 = arith.addf %179, %185 : vector<4x512xf32>
    %c3_86 = arith.constant 3 : index
    %c0_87 = arith.constant 0 : index
    %c0_88 = arith.constant 0 : index
    %187 = vector.load %arg7[%c3_86, %c0_87, %c0_88] : memref<9x4x8xf32, #tpu.memory_space<vmem>>, vector<1x4x8xf32>
    %188 = vector.shape_cast %187 : vector<1x4x8xf32> to vector<4x8xf32>
    %cst_89 = arith.constant dense<0.000000e+00> : vector<4x512xf32>
    %189 = tpu.matmul %188, %164, %cst_89 {dimension_numbers = #tpu.dot_dimension_numbers<[1], [0], [0], [1], [0, 0, 1, 1], [], []>} : vector<4x8xf32>, vector<8x512xf32>, vector<4x512xf32> -> vector<4x512xf32>
    %c1_i32_90 = arith.constant 1 : i32
    %190 = tpu.dynamic_rotate %189 by %c1_i32_90 dim 1 : vector<4x512xf32>, i32 -> vector<4x512xf32>
    %191 = vector.broadcast %46 : vector<1x512xf32> to vector<4x512xf32>
    %192 = arith.mulf %190, %191 : vector<4x512xf32>
    %193 = arith.addf %186, %192 : vector<4x512xf32>
    %c4_91 = arith.constant 4 : index
    %c0_92 = arith.constant 0 : index
    %c0_93 = arith.constant 0 : index
    %194 = vector.load %arg7[%c4_91, %c0_92, %c0_93] : memref<9x4x8xf32, #tpu.memory_space<vmem>>, vector<1x4x8xf32>
    %195 = vector.shape_cast %194 : vector<1x4x8xf32> to vector<4x8xf32>
    %cst_94 = arith.constant dense<0.000000e+00> : vector<4x512xf32>
    %196 = tpu.matmul %195, %164, %cst_94 {dimension_numbers = #tpu.dot_dimension_numbers<[1], [0], [0], [1], [0, 0, 1, 1], [], []>} : vector<4x8xf32>, vector<8x512xf32>, vector<4x512xf32> -> vector<4x512xf32>
    %197 = arith.addf %193, %196 : vector<4x512xf32>
    %c5_95 = arith.constant 5 : index
    %c0_96 = arith.constant 0 : index
    %c0_97 = arith.constant 0 : index
    %198 = vector.load %arg7[%c5_95, %c0_96, %c0_97] : memref<9x4x8xf32, #tpu.memory_space<vmem>>, vector<1x4x8xf32>
    %199 = vector.shape_cast %198 : vector<1x4x8xf32> to vector<4x8xf32>
    %cst_98 = arith.constant dense<0.000000e+00> : vector<4x512xf32>
    %200 = tpu.matmul %199, %164, %cst_98 {dimension_numbers = #tpu.dot_dimension_numbers<[1], [0], [0], [1], [0, 0, 1, 1], [], []>} : vector<4x8xf32>, vector<8x512xf32>, vector<4x512xf32> -> vector<4x512xf32>
    %c511_i32_99 = arith.constant 511 : i32
    %201 = tpu.dynamic_rotate %200 by %c511_i32_99 dim 1 : vector<4x512xf32>, i32 -> vector<4x512xf32>
    %202 = vector.broadcast %50 : vector<1x512xf32> to vector<4x512xf32>
    %203 = arith.mulf %201, %202 : vector<4x512xf32>
    %204 = arith.addf %197, %203 : vector<4x512xf32>
    %c6_100 = arith.constant 6 : index
    %c0_101 = arith.constant 0 : index
    %c0_102 = arith.constant 0 : index
    %205 = vector.load %arg7[%c6_100, %c0_101, %c0_102] : memref<9x4x8xf32, #tpu.memory_space<vmem>>, vector<1x4x8xf32>
    %206 = vector.shape_cast %205 : vector<1x4x8xf32> to vector<4x8xf32>
    %cst_103 = arith.constant dense<0.000000e+00> : vector<4x512xf32>
    %207 = tpu.matmul %206, %164, %cst_103 {dimension_numbers = #tpu.dot_dimension_numbers<[1], [0], [0], [1], [0, 0, 1, 1], [], []>} : vector<4x8xf32>, vector<8x512xf32>, vector<4x512xf32> -> vector<4x512xf32>
    %c497_i32_104 = arith.constant 497 : i32
    %208 = tpu.dynamic_rotate %207 by %c497_i32_104 dim 1 : vector<4x512xf32>, i32 -> vector<4x512xf32>
    %209 = vector.broadcast %53 : vector<1x512xf32> to vector<4x512xf32>
    %210 = arith.mulf %208, %209 : vector<4x512xf32>
    %211 = arith.addf %204, %210 : vector<4x512xf32>
    %c7_105 = arith.constant 7 : index
    %c0_106 = arith.constant 0 : index
    %c0_107 = arith.constant 0 : index
    %212 = vector.load %arg7[%c7_105, %c0_106, %c0_107] : memref<9x4x8xf32, #tpu.memory_space<vmem>>, vector<1x4x8xf32>
    %213 = vector.shape_cast %212 : vector<1x4x8xf32> to vector<4x8xf32>
    %cst_108 = arith.constant dense<0.000000e+00> : vector<4x512xf32>
    %214 = tpu.matmul %213, %164, %cst_108 {dimension_numbers = #tpu.dot_dimension_numbers<[1], [0], [0], [1], [0, 0, 1, 1], [], []>} : vector<4x8xf32>, vector<8x512xf32>, vector<4x512xf32> -> vector<4x512xf32>
    %c496_i32_109 = arith.constant 496 : i32
    %215 = tpu.dynamic_rotate %214 by %c496_i32_109 dim 1 : vector<4x512xf32>, i32 -> vector<4x512xf32>
    %216 = vector.broadcast %42 : vector<1x512xf32> to vector<4x512xf32>
    %217 = arith.mulf %215, %216 : vector<4x512xf32>
    %218 = arith.addf %211, %217 : vector<4x512xf32>
    %c8_110 = arith.constant 8 : index
    %c0_111 = arith.constant 0 : index
    %c0_112 = arith.constant 0 : index
    %219 = vector.load %arg7[%c8_110, %c0_111, %c0_112] : memref<9x4x8xf32, #tpu.memory_space<vmem>>, vector<1x4x8xf32>
    %220 = vector.shape_cast %219 : vector<1x4x8xf32> to vector<4x8xf32>
    %cst_113 = arith.constant dense<0.000000e+00> : vector<4x512xf32>
    %221 = tpu.matmul %220, %164, %cst_113 {dimension_numbers = #tpu.dot_dimension_numbers<[1], [0], [0], [1], [0, 0, 1, 1], [], []>} : vector<4x8xf32>, vector<8x512xf32>, vector<4x512xf32> -> vector<4x512xf32>
    %c495_i32_114 = arith.constant 495 : i32
    %222 = tpu.dynamic_rotate %221 by %c495_i32_114 dim 1 : vector<4x512xf32>, i32 -> vector<4x512xf32>
    %223 = vector.broadcast %54 : vector<1x512xf32> to vector<4x512xf32>
    %224 = arith.mulf %222, %223 : vector<4x512xf32>
    %225 = arith.addf %218, %224 : vector<4x512xf32>
    %c8_115 = arith.constant 8 : index
    %c0_116 = arith.constant 0 : index
    %226 = vector.load %arg11[%c8_115, %c0_116] : memref<16x512xf32, #tpu.memory_space<vmem>>, vector<4x512xf32>
    tpu.vector_store %arg11[%c8_115, %c0_116], %225 {strides = array<i32>} : memref<16x512xf32, #tpu.memory_space<vmem>>, vector<4x512xf32>,
    %c0_117 = arith.constant 0 : index
    %c0_118 = arith.constant 0 : index
    %227 = vector.load %arg11[%c0_117, %c0_118] : memref<16x512xf32, #tpu.memory_space<vmem>>, vector<12x512xf32>
    %cst_119 = arith.constant dense<0.000000e+00> : vector<12xf32>
    %228 = vector.multi_reduction <add>, %227, %cst_119 [1] : vector<12x512xf32> to vector<12xf32>
    %229 = vector.shape_cast %228 : vector<12xf32> to vector<12x1xf32>
    %cst_120 = arith.constant 5.120000e+02 : f32
    %230 = vector.broadcast %cst_120 : f32 to vector<12x1xf32>
    %231 = arith.divf %229, %230 : vector<12x1xf32>
    %232 = vector.broadcast %231 : vector<12x1xf32> to vector<12x512xf32>
    %233 = arith.subf %227, %232 : vector<12x512xf32>
    %234 = arith.mulf %233, %233 : vector<12x512xf32>
    %cst_121 = arith.constant dense<0.000000e+00> : vector<12xf32>
    %235 = vector.multi_reduction <add>, %234, %cst_121 [1] : vector<12x512xf32> to vector<12xf32>
    %236 = vector.shape_cast %235 : vector<12xf32> to vector<12x1xf32>
    %cst_122 = arith.constant 5.120000e+02 : f32
    %237 = vector.broadcast %cst_122 : f32 to vector<12x1xf32>
    %238 = arith.divf %236, %237 : vector<12x1xf32>
    %c0_123 = arith.constant 0 : index
    %c0_124 = arith.constant 0 : index
    %239 = vector.load %arg8[%c0_123, %c0_124] : memref<12x1xf32, #tpu.memory_space<vmem>>, vector<12x1xf32>
    %cst_125 = arith.constant 9.99999974E-6 : f32
    %240 = vector.broadcast %cst_125 : f32 to vector<12x1xf32>
    %241 = arith.addf %238, %240 : vector<12x1xf32>
    %242 = math.rsqrt %241 : vector<12x1xf32>
    %243 = arith.mulf %239, %242 : vector<12x1xf32>
    %244 = vector.broadcast %243 : vector<12x1xf32> to vector<12x512xf32>
    %245 = arith.mulf %233, %244 : vector<12x512xf32>
    %c0_126 = arith.constant 0 : index
    %c0_127 = arith.constant 0 : index
    %246 = vector.load %arg9[%c0_126, %c0_127] : memref<12x1xf32, #tpu.memory_space<vmem>>, vector<12x1xf32>
    %247 = vector.broadcast %246 : vector<12x1xf32> to vector<12x512xf32>
    %248 = arith.addf %245, %247 : vector<12x512xf32>
    %cst_128 = arith.constant 0.000000e+00 : f32
    %249 = vector.broadcast %cst_128 : f32 to vector<12x512xf32>
    %250 = arith.maximumf %248, %249 : vector<12x512xf32>
    %cst_129 = arith.constant 0.000000e+00 : f32
    %251 = vector.broadcast %cst_129 : f32 to vector<4x512xf32>
    %c0_130 = arith.constant 0 : index
    %c0_131 = arith.constant 0 : index
    %c0_132 = arith.constant 0 : index
    %252 = vector.load %arg10[%c0_130, %c0_131, %c0_132] : memref<9x4x12xf32, #tpu.memory_space<vmem>>, vector<1x4x12xf32>
    %253 = vector.shape_cast %252 : vector<1x4x12xf32> to vector<4x12xf32>
    %cst_133 = arith.constant dense<0.000000e+00> : vector<4x512xf32>
    %254 = tpu.matmul %253, %250, %cst_133 {dimension_numbers = #tpu.dot_dimension_numbers<[1], [0], [0], [1], [0, 0, 1, 1], [], []>} : vector<4x12xf32>, vector<12x512xf32>, vector<4x512xf32> -> vector<4x512xf32>
    %c17_i32_134 = arith.constant 17 : i32
    %255 = tpu.dynamic_rotate %254 by %c17_i32_134 dim 1 : vector<4x512xf32>, i32 -> vector<4x512xf32>
    %256 = vector.broadcast %51 : vector<1x512xf32> to vector<4x512xf32>
    %257 = arith.mulf %255, %256 : vector<4x512xf32>
    %258 = arith.addf %251, %257 : vector<4x512xf32>
    %c1_135 = arith.constant 1 : index
    %c0_136 = arith.constant 0 : index
    %c0_137 = arith.constant 0 : index
    %259 = vector.load %arg10[%c1_135, %c0_136, %c0_137] : memref<9x4x12xf32, #tpu.memory_space<vmem>>, vector<1x4x12xf32>
    %260 = vector.shape_cast %259 : vector<1x4x12xf32> to vector<4x12xf32>
    %cst_138 = arith.constant dense<0.000000e+00> : vector<4x512xf32>
    %261 = tpu.matmul %260, %250, %cst_138 {dimension_numbers = #tpu.dot_dimension_numbers<[1], [0], [0], [1], [0, 0, 1, 1], [], []>} : vector<4x12xf32>, vector<12x512xf32>, vector<4x512xf32> -> vector<4x512xf32>
    %c16_i32_139 = arith.constant 16 : i32
    %262 = tpu.dynamic_rotate %261 by %c16_i32_139 dim 1 : vector<4x512xf32>, i32 -> vector<4x512xf32>
    %263 = vector.broadcast %38 : vector<1x512xf32> to vector<4x512xf32>
    %264 = arith.mulf %262, %263 : vector<4x512xf32>
    %265 = arith.addf %258, %264 : vector<4x512xf32>
    %c2_140 = arith.constant 2 : index
    %c0_141 = arith.constant 0 : index
    %c0_142 = arith.constant 0 : index
    %266 = vector.load %arg10[%c2_140, %c0_141, %c0_142] : memref<9x4x12xf32, #tpu.memory_space<vmem>>, vector<1x4x12xf32>
    %267 = vector.shape_cast %266 : vector<1x4x12xf32> to vector<4x12xf32>
    %cst_143 = arith.constant dense<0.000000e+00> : vector<4x512xf32>
    %268 = tpu.matmul %267, %250, %cst_143 {dimension_numbers = #tpu.dot_dimension_numbers<[1], [0], [0], [1], [0, 0, 1, 1], [], []>} : vector<4x12xf32>, vector<12x512xf32>, vector<4x512xf32> -> vector<4x512xf32>
    %c15_i32_144 = arith.constant 15 : i32
    %269 = tpu.dynamic_rotate %268 by %c15_i32_144 dim 1 : vector<4x512xf32>, i32 -> vector<4x512xf32>
    %270 = vector.broadcast %52 : vector<1x512xf32> to vector<4x512xf32>
    %271 = arith.mulf %269, %270 : vector<4x512xf32>
    %272 = arith.addf %265, %271 : vector<4x512xf32>
    %c3_145 = arith.constant 3 : index
    %c0_146 = arith.constant 0 : index
    %c0_147 = arith.constant 0 : index
    %273 = vector.load %arg10[%c3_145, %c0_146, %c0_147] : memref<9x4x12xf32, #tpu.memory_space<vmem>>, vector<1x4x12xf32>
    %274 = vector.shape_cast %273 : vector<1x4x12xf32> to vector<4x12xf32>
    %cst_148 = arith.constant dense<0.000000e+00> : vector<4x512xf32>
    %275 = tpu.matmul %274, %250, %cst_148 {dimension_numbers = #tpu.dot_dimension_numbers<[1], [0], [0], [1], [0, 0, 1, 1], [], []>} : vector<4x12xf32>, vector<12x512xf32>, vector<4x512xf32> -> vector<4x512xf32>
    %c1_i32_149 = arith.constant 1 : i32
    %276 = tpu.dynamic_rotate %275 by %c1_i32_149 dim 1 : vector<4x512xf32>, i32 -> vector<4x512xf32>
    %277 = vector.broadcast %46 : vector<1x512xf32> to vector<4x512xf32>
    %278 = arith.mulf %276, %277 : vector<4x512xf32>
    %279 = arith.addf %272, %278 : vector<4x512xf32>
    %c4_150 = arith.constant 4 : index
    %c0_151 = arith.constant 0 : index
    %c0_152 = arith.constant 0 : index
    %280 = vector.load %arg10[%c4_150, %c0_151, %c0_152] : memref<9x4x12xf32, #tpu.memory_space<vmem>>, vector<1x4x12xf32>
    %281 = vector.shape_cast %280 : vector<1x4x12xf32> to vector<4x12xf32>
    %cst_153 = arith.constant dense<0.000000e+00> : vector<4x512xf32>
    %282 = tpu.matmul %281, %250, %cst_153 {dimension_numbers = #tpu.dot_dimension_numbers<[1], [0], [0], [1], [0, 0, 1, 1], [], []>} : vector<4x12xf32>, vector<12x512xf32>, vector<4x512xf32> -> vector<4x512xf32>
    %283 = arith.addf %279, %282 : vector<4x512xf32>
    %c5_154 = arith.constant 5 : index
    %c0_155 = arith.constant 0 : index
    %c0_156 = arith.constant 0 : index
    %284 = vector.load %arg10[%c5_154, %c0_155, %c0_156] : memref<9x4x12xf32, #tpu.memory_space<vmem>>, vector<1x4x12xf32>
    %285 = vector.shape_cast %284 : vector<1x4x12xf32> to vector<4x12xf32>
    %cst_157 = arith.constant dense<0.000000e+00> : vector<4x512xf32>
    %286 = tpu.matmul %285, %250, %cst_157 {dimension_numbers = #tpu.dot_dimension_numbers<[1], [0], [0], [1], [0, 0, 1, 1], [], []>} : vector<4x12xf32>, vector<12x512xf32>, vector<4x512xf32> -> vector<4x512xf32>
    %c511_i32_158 = arith.constant 511 : i32
    %287 = tpu.dynamic_rotate %286 by %c511_i32_158 dim 1 : vector<4x512xf32>, i32 -> vector<4x512xf32>
    %288 = vector.broadcast %50 : vector<1x512xf32> to vector<4x512xf32>
    %289 = arith.mulf %287, %288 : vector<4x512xf32>
    %290 = arith.addf %283, %289 : vector<4x512xf32>
    %c6_159 = arith.constant 6 : index
    %c0_160 = arith.constant 0 : index
    %c0_161 = arith.constant 0 : index
    %291 = vector.load %arg10[%c6_159, %c0_160, %c0_161] : memref<9x4x12xf32, #tpu.memory_space<vmem>>, vector<1x4x12xf32>
    %292 = vector.shape_cast %291 : vector<1x4x12xf32> to vector<4x12xf32>
    %cst_162 = arith.constant dense<0.000000e+00> : vector<4x512xf32>
    %293 = tpu.matmul %292, %250, %cst_162 {dimension_numbers = #tpu.dot_dimension_numbers<[1], [0], [0], [1], [0, 0, 1, 1], [], []>} : vector<4x12xf32>, vector<12x512xf32>, vector<4x512xf32> -> vector<4x512xf32>
    %c497_i32_163 = arith.constant 497 : i32
    %294 = tpu.dynamic_rotate %293 by %c497_i32_163 dim 1 : vector<4x512xf32>, i32 -> vector<4x512xf32>
    %295 = vector.broadcast %53 : vector<1x512xf32> to vector<4x512xf32>
    %296 = arith.mulf %294, %295 : vector<4x512xf32>
    %297 = arith.addf %290, %296 : vector<4x512xf32>
    %c7_164 = arith.constant 7 : index
    %c0_165 = arith.constant 0 : index
    %c0_166 = arith.constant 0 : index
    %298 = vector.load %arg10[%c7_164, %c0_165, %c0_166] : memref<9x4x12xf32, #tpu.memory_space<vmem>>, vector<1x4x12xf32>
    %299 = vector.shape_cast %298 : vector<1x4x12xf32> to vector<4x12xf32>
    %cst_167 = arith.constant dense<0.000000e+00> : vector<4x512xf32>
    %300 = tpu.matmul %299, %250, %cst_167 {dimension_numbers = #tpu.dot_dimension_numbers<[1], [0], [0], [1], [0, 0, 1, 1], [], []>} : vector<4x12xf32>, vector<12x512xf32>, vector<4x512xf32> -> vector<4x512xf32>
    %c496_i32_168 = arith.constant 496 : i32
    %301 = tpu.dynamic_rotate %300 by %c496_i32_168 dim 1 : vector<4x512xf32>, i32 -> vector<4x512xf32>
    %302 = vector.broadcast %42 : vector<1x512xf32> to vector<4x512xf32>
    %303 = arith.mulf %301, %302 : vector<4x512xf32>
    %304 = arith.addf %297, %303 : vector<4x512xf32>
    %c8_169 = arith.constant 8 : index
    %c0_170 = arith.constant 0 : index
    %c0_171 = arith.constant 0 : index
    %305 = vector.load %arg10[%c8_169, %c0_170, %c0_171] : memref<9x4x12xf32, #tpu.memory_space<vmem>>, vector<1x4x12xf32>
    %306 = vector.shape_cast %305 : vector<1x4x12xf32> to vector<4x12xf32>
    %cst_172 = arith.constant dense<0.000000e+00> : vector<4x512xf32>
    %307 = tpu.matmul %306, %250, %cst_172 {dimension_numbers = #tpu.dot_dimension_numbers<[1], [0], [0], [1], [0, 0, 1, 1], [], []>} : vector<4x12xf32>, vector<12x512xf32>, vector<4x512xf32> -> vector<4x512xf32>
    %c495_i32_173 = arith.constant 495 : i32
    %308 = tpu.dynamic_rotate %307 by %c495_i32_173 dim 1 : vector<4x512xf32>, i32 -> vector<4x512xf32>
    %309 = vector.broadcast %54 : vector<1x512xf32> to vector<4x512xf32>
    %310 = arith.mulf %308, %309 : vector<4x512xf32>
    %311 = arith.addf %304, %310 : vector<4x512xf32>
    %c12 = arith.constant 12 : index
    %c0_174 = arith.constant 0 : index
    %312 = vector.load %arg11[%c12, %c0_174] : memref<16x512xf32, #tpu.memory_space<vmem>>, vector<4x512xf32>
    tpu.vector_store %arg11[%c12, %c0_174], %311 {strides = array<i32>} : memref<16x512xf32, #tpu.memory_space<vmem>>, vector<4x512xf32>,
    return
  }
  func.func @transform_0(%arg0: i32) -> (i32, i32) {
    %c0_i32 = arith.constant 0 : i32
    %c0_i32_0 = arith.constant 0 : i32
    %c0_i32_1 = arith.constant 0 : i32
    return %c0_i32, %c0_i32_0 : i32, i32
  }
  func.func @transform_1(%arg0: i32) -> (i32, i32) {
    %c0_i32 = arith.constant 0 : i32
    %c0_i32_0 = arith.constant 0 : i32
    %c0_i32_1 = arith.constant 0 : i32
    return %c0_i32, %c0_i32_0 : i32, i32
  }
  func.func @transform_2(%arg0: i32) -> (i32, i32) {
    %c0_i32 = arith.constant 0 : i32
    %c0_i32_0 = arith.constant 0 : i32
    %c0_i32_1 = arith.constant 0 : i32
    return %c0_i32, %c0_i32_0 : i32, i32
  }
  func.func @transform_3(%arg0: i32) -> (i32, i32, i32) {
    %c0_i32 = arith.constant 0 : i32
    %c0_i32_0 = arith.constant 0 : i32
    %c0_i32_1 = arith.constant 0 : i32
    %c0_i32_2 = arith.constant 0 : i32
    return %c0_i32, %c0_i32_0, %c0_i32_1 : i32, i32, i32
  }
  func.func @transform_4(%arg0: i32) -> (i32, i32) {
    %c0_i32 = arith.constant 0 : i32
    %c0_i32_0 = arith.constant 0 : i32
    %c0_i32_1 = arith.constant 0 : i32
    return %c0_i32, %c0_i32_0 : i32, i32
  }
  func.func @transform_5(%arg0: i32) -> (i32, i32) {
    %c0_i32 = arith.constant 0 : i32
    %c0_i32_0 = arith.constant 0 : i32
    %c0_i32_1 = arith.constant 0 : i32
    return %c0_i32, %c0_i32_0 : i32, i32
  }
  func.func @transform_6(%arg0: i32) -> (i32, i32, i32) {
    %c0_i32 = arith.constant 0 : i32
    %c0_i32_0 = arith.constant 0 : i32
    %c0_i32_1 = arith.constant 0 : i32
    %c0_i32_2 = arith.constant 0 : i32
    return %c0_i32, %c0_i32_0, %c0_i32_1 : i32, i32, i32
  }
  func.func @transform_7(%arg0: i32) -> (i32, i32) {
    %c0_i32 = arith.constant 0 : i32
    %c0_i32_0 = arith.constant 0 : i32
    %c0_i32_1 = arith.constant 0 : i32
    return %c0_i32, %c0_i32_0 : i32, i32
  }
  func.func @transform_8(%arg0: i32) -> (i32, i32) {
    %c0_i32 = arith.constant 0 : i32
    %c0_i32_0 = arith.constant 0 : i32
    %c0_i32_1 = arith.constant 0 : i32
    return %c0_i32, %c0_i32_0 : i32, i32
  }
  func.func @transform_9(%arg0: i32) -> (i32, i32, i32) {
    %c0_i32 = arith.constant 0 : i32
    %c0_i32_0 = arith.constant 0 : i32
    %c0_i32_1 = arith.constant 0 : i32
    %c0_i32_2 = arith.constant 0 : i32
    return %c0_i32, %c0_i32_0, %c0_i32_1 : i32, i32, i32
  }
  func.func @transform_10(%arg0: i32) -> (i32, i32) {
    %c0_i32 = arith.constant 0 : i32
    %c0_i32_0 = arith.constant 0 : i32
    %c0_i32_1 = arith.constant 0 : i32
    return %c0_i32, %c0_i32_0 : i32, i32
  }
}

</mosaic_0001>

<bundles_post_ra>
// kernel: dense_block_apply.1
= control target key start
LH: loop header
LB: loop body
LE: loop exit
PB: predicated region body
PF: predicated region fallthrough
CT: control target
= control target key end

     0   :  { %vm216_vm0 = vcmask 1043456   ;;  %v5151_v32 = vmov 0   ;;  %v6427_v40 = vmov 0.0   ;;  %vm274_vm1 = vcmask 31744   ;;  %s5153_s11 = smov 17   ;;  %s5155_s12 = smov 15   ;;  %s6416_s0 = inlined_call_operand.vmem [shape: f32[4,512], index: 0, kind: input, shape index: {}]   ;;  %s6417_s10 = inlined_call_operand.vmem [shape: f32[16,512], index: 10, kind: output, shape index: {}]   ;;  %s6418_s1 = inlined_call_operand.vmem [shape: f32[4,1], index: 1, kind: input, shape index: {}]   ;;  %s6419_s2 = inlined_call_operand.vmem [shape: f32[4,1], index: 2, kind: input, shape index: {}]   ;;  %s6420_s3 = inlined_call_operand.vmem [shape: f32[9,4,4], index: 3, kind: input, shape index: {}]   ;;  %s6421_s5 = inlined_call_operand.vmem [shape: f32[8,1], index: 5, kind: input, shape index: {}]   ;;  %s6422_s4 = inlined_call_operand.vmem [shape: f32[8,1], index: 4, kind: input, shape index: {}]   ;;  %s6423_s6 = inlined_call_operand.vmem [shape: f32[9,4,8], index: 6, kind: input, shape index: {}]   ;;  %s6424_s8 = inlined_call_operand.vmem [shape: f32[12,1], index: 8, kind: input, shape index: {}]   ;;  %s6425_s7 = inlined_call_operand.vmem [shape: f32[12,1], index: 7, kind: input, shape index: {}]   ;;  %s6426_s9 = inlined_call_operand.vmem [shape: f32[9,4,12], index: 9, kind: input, shape index: {}]  }
   0x1   :  { %v35_v0 = vld [vmem:[%s6416_s0] sm:$0xff]  ;;  %v36_v1 = vld [vmem:[%s6416_s0 + $0x8] sm:$0xff]  ;;  %5139 = vset.pattern.permute.xlu1 %v5151_v32  ;;  %5140 = vset.pattern.permute.xlu0 %v5151_v32  ;;  %v5006_v59 = vld [vmem:[%s6420_s3 + $0x10] sm:$0xf]  ;;  %s5156_s13 = smov 1   ;;  %s5157_s14 = smov 127  }
   0x2   :  { %v39_v2 = vcombine.high %v35_v0, %v35_v0  ;;  %v40_v3 = vcombine.high %v36_v1, %v36_v1  ;;  %43 = vst [vmem:[%s6417_s10] sm:$0xf] %v35_v0  ;;  %45 = vst [vmem:[%s6417_s10 + $0x10] sm:$0xf] %v36_v1  ;;  %v246_v36 = vld [vmem:[%s6418_s1] sm:$0xf]  ;;  %354 = vmatprep.mubr.f32.mxu0 %v6427_v40  ;;  %425 = vmatprep.mubr.f32.mxu1 %v6427_v40  ;;  %s5158_s15 = smov 113  }
   0x3   :  { %v259_v39 = vld [vmem:[%s6419_s2] sm:$0xf]  ;;  %v4985_v56 = vld [vmem:[%s6420_s3 + $0x4] sm:$0xf]  ;;  %v4992_v57 = vld [vmem:[%s6420_s3 + $0x8] sm:$0xf] }
   0x4   :  { %44 = vst [vmem:[%s6417_s10 + $0x8] sm:$0xf] %v39_v2  ;;  %46 = vst [vmem:[%s6417_s10 + $0x18] sm:$0xf] %v40_v3  ;;  %v273_v55 = vld [vmem:[%s6420_s3] sm:$0xf] }
   0x5   :  { %v4999_v58 = vld [vmem:[%s6420_s3 + $0xc] sm:$0xf]  ;;  %v5013_v60 = vld [vmem:[%s6420_s3 + $0x14] sm:$0xf]  ;;  %v5020_v61 = vld [vmem:[%s6420_s3 + $0x18] sm:$0xf] }
   0x6   :  { %v5027_v62 = vld [vmem:[%s6420_s3 + $0x1c] sm:$0xf]  ;;  %v5034_v63 = vld [vmem:[%s6420_s3 + $0x20] sm:$0xf]  ;;  %s5154_s3 = smov 16   ;;  %s5159_s1 = smov 112  }
   0x7   :  { %s5160_s2 = smov 111  }
   0x9   :  { %v212_v4 = vld [vmem:[%s6417_s10] sm:$0xf]  ;;  %v214_v5 = vld [vmem:[%s6417_s10 + $0x10] sm:$0xf] }
   0xa   :  { %v217_v6 = vsel %vm216_vm0, %v212_v4, 0.0  ;;  %v220_v10 = vsel %vm216_vm0, %v214_v5, 0.0 }
   0xb   :  { %v213_v7 = vld [vmem:[%s6417_s10 + $0x8] sm:$0xf]  ;;  %v215_v8 = vld [vmem:[%s6417_s10 + $0x18] sm:$0xf] }
   0xc   :  { %v218_v9 = vsel %vm216_vm0, %v213_v7, 0.0  ;;  %v222_v12 = vsel %vm216_vm0, %v215_v8, 0.0 }
   0xd   :  { %v219_v11 = vadd.f32 %v218_v9, %v217_v6 }
   0xf   :  { %v221_v13 = vadd.f32 %v220_v10, %v219_v11 }
  0x11   :  { %v223_v14 = vadd.f32 %v222_v12, %v221_v13 }
  0x13   :  { %224 = vadd.xlane.f32.xlu0 %v223_v14 }
  0x9c   :  { %v225_v15 = vpop.xlane.xlu0 %224 }
  0x9d   :  { %v227_v16 = vmul.f32 0.001953125, %v225_v15 }
  0x9f   :  { %v228_v17 = vsub.f32 %v212_v4, %v227_v16  ;;  %v229_v18 = vsub.f32 %v213_v7, %v227_v16  ;;  %v230_v19 = vsub.f32 %v214_v5, %v227_v16  ;;  %v231_v20 = vsub.f32 %v215_v8, %v227_v16 }
  0xa1   :  { %v232_v21 = vmul.f32 %v228_v17, %v228_v17  ;;  %v233_v22 = vmul.f32 %v229_v18, %v229_v18  ;;  %v234_v23 = vmul.f32 %v230_v19, %v230_v19  ;;  %v235_v24 = vmul.f32 %v231_v20, %v231_v20 }
  0xa3   :  { %v236_v25 = vsel %vm216_vm0, %v232_v21, 0.0  ;;  %v237_v26 = vsel %vm216_vm0, %v233_v22, 0.0  ;;  %v239_v28 = vsel %vm216_vm0, %v234_v23, 0.0  ;;  %v241_v30 = vsel %vm216_vm0, %v235_v24, 0.0 }
  0xa4   :  { %v238_v27 = vadd.f32 %v237_v26, %v236_v25 }
  0xa6   :  { %v240_v29 = vadd.f32 %v239_v28, %v238_v27 }
  0xa8   :  { %v242_v31 = vadd.f32 %v241_v30, %v240_v29 }
  0xaa   :  { %243 = vadd.xlane.f32.xlu0 %v242_v31 }
 0x133   :  { %v244_v33 = vpop.xlane.xlu0 %243 }
 0x134   :  { %v245_v34 = vmul.f32 0.001953125, %v244_v33 }
 0x136   :  { %v247_v35 = vadd.f32 1e-05, %v245_v34 }
 0x138   :  { %5143 = vrsqrt.f32 %v247_v35 }
 0x145   :  { %v5144_v37 = vpop.eup %5143 }
 0x146   :  { %v249_v38 = vmul.f32 %v5144_v37, %v246_v36 }
 0x148   :  { %252 = vperm.xlu1 %5139, %v249_v38  }
 0x14c   :  { %262 = vperm.xlu1 %5139, %v259_v39  }
 0x1c3   :  { %v253_v41 = vpop.permute.xlu1 %252 }
 0x1c4   :  { %v255_v42 = vmul.f32 %v253_v41, %v228_v17  ;;  %v256_v43 = vmul.f32 %v253_v41, %v229_v18  ;;  %v257_v44 = vmul.f32 %v253_v41, %v230_v19  ;;  %v258_v45 = vmul.f32 %v253_v41, %v231_v20 }
 0x1c7   :  { %v263_v46 = vpop.permute.xlu1 %262 }
 0x1c8   :  { %v265_v47 = vadd.f32 %v263_v46, %v255_v42  ;;  %v266_v48 = vadd.f32 %v263_v46, %v256_v43  ;;  %v267_v49 = vadd.f32 %v263_v46, %v257_v44  ;;  %v268_v50 = vadd.f32 %v263_v46, %v258_v45 }
 0x1c9   :  { %v47_v45 = vlaneseq }
 0x1ca   :  { %v5262_v51 = vmax.f32 %v265_v47, 0.0  ;;  %v5264_v52 = vmax.f32 %v266_v48, 0.0  ;;  %v5266_v53 = vmax.f32 %v267_v49, 0.0  ;;  %v5268_v54 = vmax.f32 %v268_v50, 0.0 }
 0x1cb   :  { %v5463_v48 = vand.u32 127, %v47_v45 }
 0x1cc   :  { %4979 = vmatprep.subr.msk.mxu0 %vm216_vm0, %v5264_v52  ;;  %4982 = vmatprep.subr.msk.mxu1 %vm216_vm0, %v5268_v54 }
 0x1cd   :  { %4980 = vmatpush1.msk.msra.mxu0 %vm216_vm0, %v5262_v51  ;;  %4983 = vmatpush1.msk.msra.mxu1 %vm216_vm0, %v5266_v53  ;;  %vm440_vm9 = vcmp.lt.s32.totalorder %v5463_v48, 17  ;;  %vm608_vm11 = vcmp.lt.s32.totalorder %v5463_v48, 16  ;;  %vm776_vm14 = vcmp.lt.s32.totalorder %v5463_v48, 15  ;;  %vm944_vm15 = vcmp.lt.s32.totalorder %v5463_v48, 1 }
 0x1ce   :  { %4981 = vmatmul.mubr.msk.f32.vlgmr.msra.gmra.mxu0 %vm274_vm1, %v273_v55  ;;  %4984 = vmatmul.mubr.msk.f32.vlgmr.msra.gmra.mxu1 %vm274_vm1, %v273_v55 }
 0x1cf   :  { %4986 = vmatprep.subr.msk.mxu0 %vm216_vm0, %v5264_v52  ;;  %4989 = vmatprep.subr.msk.mxu1 %vm216_vm0, %v5268_v54 }
 0x1d0   :  { %4987 = vmatpush1.msk.msra.mxu0 %vm216_vm0, %v5262_v51  ;;  %4990 = vmatpush1.msk.msra.mxu1 %vm216_vm0, %v5266_v53 }
 0x1d1   :  { %4993 = vmatprep.subr.msk.mxu0 %vm216_vm0, %v5264_v52  ;;  %4996 = vmatprep.subr.msk.mxu1 %vm216_vm0, %v5268_v54 }
 0x1d2   :  { %522 = vmatprep.mubr.f32.mxu0 %v6427_v40  ;;  %593 = vmatprep.mubr.f32.mxu1 %v6427_v40 }
 0x1d3   :  { %4988 = vmatmul.mubr.msk.f32.vlgmr.msra.gmra.mxu0 %vm274_vm1, %v4985_v56  ;;  %4991 = vmatmul.mubr.msk.f32.vlgmr.msra.gmra.mxu1 %vm274_vm1, %v4985_v56  ;;  %v5476_v56 = vadd.s32 384, %v5463_v48 }
 0x1d4   :  { %4994 = vmatpush1.msk.msra.mxu0 %vm216_vm0, %v5262_v51  ;;  %4997 = vmatpush1.msk.msra.mxu1 %vm216_vm0, %v5266_v53 }
 0x1d5   :  { %5000 = vmatprep.subr.msk.mxu0 %vm216_vm0, %v5264_v52  ;;  %5003 = vmatprep.subr.msk.mxu1 %vm216_vm0, %v5268_v54 }
 0x1d6   :  { %690 = vmatprep.mubr.f32.mxu0 %v6427_v40  ;;  %761 = vmatprep.mubr.f32.mxu1 %v6427_v40 }
 0x1d7   :  { %4995 = vmatmul.mubr.msk.f32.vlgmr.msra.gmra.mxu0 %vm274_vm1, %v4992_v57  ;;  %4998 = vmatmul.mubr.msk.f32.vlgmr.msra.gmra.mxu1 %vm274_vm1, %v4992_v57  ;;  %v56_v57 = vand.u32 255, %v5463_v48 }
 0x1d8   :  { %5001 = vmatpush1.msk.msra.mxu0 %vm216_vm0, %v5262_v51  ;;  %5004 = vmatpush1.msk.msra.mxu1 %vm216_vm0, %v5266_v53 }
 0x1d9   :  { %5007 = vmatprep.subr.msk.mxu0 %vm216_vm0, %v5264_v52  ;;  %5010 = vmatprep.subr.msk.mxu1 %vm216_vm0, %v5268_v54  ;;  %vm148_vm4 = vcmp.ge.s32.totalorder %v56_v57, 16 }
 0x1da   :  { %858 = vmatprep.mubr.f32.mxu0 %v6427_v40  ;;  %929 = vmatprep.mubr.f32.mxu1 %v6427_v40 }
 0x1db   :  { %5002 = vmatmul.mubr.msk.f32.vlgmr.msra.gmra.mxu0 %vm274_vm1, %v4999_v58  ;;  %5005 = vmatmul.mubr.msk.f32.vlgmr.msra.gmra.mxu1 %vm274_vm1, %v4999_v58 }
 0x1dc   :  { %5008 = vmatpush1.msk.msra.mxu0 %vm216_vm0, %v5262_v51  ;;  %5011 = vmatpush1.msk.msra.mxu1 %vm216_vm0, %v5266_v53 }
 0x1dd   :  { %5014 = vmatprep.subr.msk.mxu0 %vm216_vm0, %v5264_v52  ;;  %5017 = vmatprep.subr.msk.mxu1 %vm216_vm0, %v5268_v54 }
 0x1de   :  { %1026 = vmatprep.mubr.f32.mxu0 %v6427_v40  ;;  %1097 = vmatprep.mubr.f32.mxu1 %v6427_v40 }
 0x1df   :  { %5009 = vmatmul.mubr.msk.f32.vlgmr.msra.gmra.mxu0 %vm274_vm1, %v5006_v59  ;;  %5012 = vmatmul.mubr.msk.f32.vlgmr.msra.gmra.mxu1 %vm274_vm1, %v5006_v59 }
 0x1e0   :  { %5015 = vmatpush1.msk.msra.mxu0 %vm216_vm0, %v5262_v51  ;;  %5018 = vmatpush1.msk.msra.mxu1 %vm216_vm0, %v5266_v53 }
 0x1e1   :  { %5021 = vmatprep.subr.msk.mxu0 %vm216_vm0, %v5264_v52  ;;  %5024 = vmatprep.subr.msk.mxu1 %vm216_vm0, %v5268_v54 }
 0x1e2   :  { %1177 = vmatprep.mubr.f32.mxu0 %v6427_v40  ;;  %1248 = vmatprep.mubr.f32.mxu1 %v6427_v40 }
 0x1e3   :  { %5016 = vmatmul.mubr.msk.f32.vlgmr.msra.gmra.mxu0 %vm274_vm1, %v5013_v60  ;;  %5019 = vmatmul.mubr.msk.f32.vlgmr.msra.gmra.mxu1 %vm274_vm1, %v5013_v60 }
 0x1e4   :  { %5022 = vmatpush1.msk.msra.mxu0 %vm216_vm0, %v5262_v51  ;;  %5025 = vmatpush1.msk.msra.mxu1 %vm216_vm0, %v5266_v53 }
 0x1e5   :  { %5028 = vmatprep.subr.msk.mxu0 %vm216_vm0, %v5264_v52  ;;  %5031 = vmatprep.subr.msk.mxu1 %vm216_vm0, %v5268_v54 }
 0x1e6   :  { %1345 = vmatprep.mubr.f32.mxu0 %v6427_v40  ;;  %1416 = vmatprep.mubr.f32.mxu1 %v6427_v40 }
 0x1e7   :  { %5023 = vmatmul.mubr.msk.f32.vlgmr.msra.gmra.mxu0 %vm274_vm1, %v5020_v61  ;;  %5026 = vmatmul.mubr.msk.f32.vlgmr.msra.gmra.mxu1 %vm274_vm1, %v5020_v61 }
 0x1e8   :  { %5029 = vmatpush1.msk.msra.mxu0 %vm216_vm0, %v5262_v51  ;;  %5032 = vmatpush1.msk.msra.mxu1 %vm216_vm0, %v5266_v53 }
 0x1e9   :  { %5035 = vmatprep.subr.msk.mxu0 %vm216_vm0, %v5264_v52  ;;  %5038 = vmatprep.subr.msk.mxu1 %vm216_vm0, %v5268_v54  ;;  %v49_v54 = vadd.s32 128, %v5463_v48 }
 0x1ea   :  { %1513 = vmatprep.mubr.f32.mxu0 %v6427_v40  ;;  %1584 = vmatprep.mubr.f32.mxu1 %v6427_v40 }
 0x1eb   :  { %5030 = vmatmul.mubr.msk.f32.vlgmr.msra.gmra.mxu0 %vm274_vm1, %v5027_v62  ;;  %5033 = vmatmul.mubr.msk.f32.vlgmr.msra.gmra.mxu1 %vm274_vm1, %v5027_v62  ;;  %v63_v60 = vand.u32 255, %v49_v54  ;;  %v77_v62 = vand.u32 255, %v5476_v56 }
 0x1ec   :  { %5036 = vmatpush1.msk.msra.mxu0 %vm216_vm0, %v5262_v51  ;;  %5039 = vmatpush1.msk.msra.mxu1 %vm216_vm0, %v5266_v53  ;;  %v50_v51 = vadd.s32 256, %v5463_v48 }
 0x1ed   :  { %1681 = vmatprep.mubr.f32.mxu0 %v6427_v40  ;;  %1752 = vmatprep.mubr.f32.mxu1 %v6427_v40 }
 0x1ee   :  { %v70_v55 = vand.u32 255, %v50_v51 }
 0x1ef   :  { %5037 = vmatmul.mubr.msk.f32.vlgmr.msra.gmra.mxu0 %vm274_vm1, %v5034_v63  ;;  %5040 = vmatmul.mubr.msk.f32.vlgmr.msra.gmra.mxu1 %vm274_vm1, %v5034_v63  ;;  %v104_v63 = vand.u32 15, %v56_v57  ;;  %vm5562_vm1 = vcmp.lt.s32.totalorder %v63_v60, 240 }
 0x1f0   :  { %1916 = vmatprep.mubr.f32.mxu0 %v6427_v40  ;;  %1987 = vmatprep.mubr.f32.mxu1 %v6427_v40  ;;  %v118_v61 = vand.u32 15, %v70_v55  ;;  %vm150_vm2 = vcmp.ge.s32.totalorder %v70_v55, 16 }
 0x1f1   :  { %vm172_vm5 = vcmp.gt.s32.totalorder %v104_v63, 0  ;;  %vm184_vm8 = vcmp.lt.s32.totalorder %v104_v63, 15 }
 0x1f2   :  { %vm174_vm3 = vcmp.gt.s32.totalorder %v118_v61, 0  ;;  %vm186_vm6 = vcmp.lt.s32.totalorder %v118_v61, 15 }
 0x28e   :  { %v356_v0 = vpop.f32.mrf.mxu0  ;;  %v427_v1 = vpop.f32.mrf.mxu1 }
 0x28f   :  { %436 = vrot.lane.b32.xlu1 %v427_v1, %s5153_s11  ;;  %432 = vrot.lane.b32.xlu0 %v356_v0, %s5153_s11  ;;  %v111_v1 = vand.u32 15, %v63_v60 }
 0x290   :  { %v358_v2 = vpop.f32.mrf.mxu0  ;;  %v429_v3 = vpop.f32.mrf.mxu1 }
 0x291   :  { %vm173_vm7 = vcmp.gt.s32.totalorder %v111_v1, 0  ;;  %vm185_vm12 = vcmp.lt.s32.totalorder %v111_v1, 15 }
 0x293   :  { %434 = vrot.lane.b32.xlu1 %v358_v2, %s5153_s11  ;;  %v595_v4 = vpop.f32.mrf.mxu1  ;;  %v524_v5 = vpop.f32.mrf.mxu0 }
 0x294   :  { %604 = vrot.lane.b32.xlu0 %v595_v4, %s5154_s3 }
 0x295   :  { %v597_v6 = vpop.f32.mrf.mxu1  ;;  %v526_v7 = vpop.f32.mrf.mxu0 }
 0x297   :  { %438 = vrot.lane.b32.xlu1 %v429_v3, %s5153_s11  ;;  %v763_v8 = vpop.f32.mrf.mxu1  ;;  %v692_v9 = vpop.f32.mrf.mxu0  ;;  %v125_v3 = vand.u32 15, %v77_v62 }
 0x298   :  { %772 = vrot.lane.b32.xlu0 %v763_v8, %s5155_s12  ;;  %v5497_v8 = vsel %vm172_vm5, 1.0, %v6427_v40  ;;  %vm1599_vm5 = vcmp.lt.s32.totalorder %v5463_v48, 112 }
 0x299   :  { %v694_v10 = vpop.f32.mrf.mxu0  ;;  %v765_v11 = vpop.f32.mrf.mxu1  ;;  %vm175_vm10 = vcmp.gt.s32.totalorder %v125_v3, 0  ;;  %vm187_vm13 = vcmp.lt.s32.totalorder %v125_v3, 15 }
 0x29b   :  { %600 = vrot.lane.b32.xlu1 %v524_v5, %s5154_s3  ;;  %v931_v12 = vpop.f32.mrf.mxu1  ;;  %v860_v13 = vpop.f32.mrf.mxu0  ;;  %v5487_v5 = vsel %vm150_vm2, 1.0, %v6427_v40  ;;  %vm1263_vm2 = vcmp.lt.s32.totalorder %v5463_v48, 127 }
 0x29c   :  { %770 = vrot.lane.b32.xlu0 %v694_v10, %s5155_s12 }
 0x29d   :  { %v862_v14 = vpop.f32.mrf.mxu0  ;;  %v933_v15 = vpop.f32.mrf.mxu1 }
 0x29f   :  { %606 = vrot.lane.b32.xlu1 %v597_v6, %s5154_s3  ;;  %v5414_v16 = vpop.f32.mrf.mxu0  ;;  %v5416_v17 = vpop.f32.mrf.mxu1  ;;  %v5490_v6 = vsel %vm174_vm3, 1.0, %v6427_v40  ;;  %vm163_vm3 = vcmp.lt.s32.totalorder %v77_v62, 240 }
 0x2a0   :  { %940 = vrot.lane.b32.xlu0 %v931_v12, %s5156_s13  ;;  %v5508_v12 = vsel %vm173_vm7, 1.0, %v6427_v40  ;;  %vm1848_vm7 = vcmask 64512  }
 0x2a1   :  { %v5419_v18 = vpop.f32.mrf.mxu0  ;;  %v5421_v19 = vpop.f32.mrf.mxu1 }
 0x2a3   :  { %602 = vrot.lane.b32.xlu1 %v526_v7, %s5154_s3  ;;  %v1179_v20 = vpop.f32.mrf.mxu0  ;;  %v1250_v22 = vpop.f32.mrf.mxu1  ;;  %v5494_v7 = vsel %vm148_vm4, 1.0, %v6427_v40  ;;  %vm1431_vm4 = vcmp.lt.s32.totalorder %v5463_v48, 113 }
 0x2a4   :  { %938 = vrot.lane.b32.xlu0 %v862_v14, %s5156_s13  ;;  %v5515_v14 = vsel %vm184_vm8, 1.0, %v6427_v40  ;;  %vm3449_vm8 = vcmask 97280  }
 0x2a5   :  { %v1181_v21 = vpop.f32.mrf.mxu0  ;;  %v1252_v23 = vpop.f32.mrf.mxu1 }
 0x2a7   :  { %768 = vrot.lane.b32.xlu1 %v692_v9, %s5155_s12  ;;  %v1347_v24 = vpop.f32.mrf.mxu0  ;;  %v1418_v26 = vpop.f32.mrf.mxu1  ;;  %v5501_v9 = vsel %vm186_vm6, 1.0, %v6427_v40  ;;  %vm1767_vm6 = vcmp.lt.s32.totalorder %v5463_v48, 111 }
 0x2a8   :  { %1257 = vrot.lane.b32.xlu0 %v1181_v21, %s5157_s14  ;;  %v5525_v21 = vmul.f32 %v5497_v8, %v5494_v7 }
 0x2a9   :  { %v1349_v25 = vpop.f32.mrf.mxu0  ;;  %v1420_v27 = vpop.f32.mrf.mxu1 }
 0x2ab   :  { %774 = vrot.lane.b32.xlu1 %v765_v11, %s5155_s12  ;;  %v1515_v28 = vpop.f32.mrf.mxu0  ;;  %v1586_v29 = vpop.f32.mrf.mxu1 }
 0x2ac   :  { %1261 = vrot.lane.b32.xlu0 %v1252_v23, %s5157_s14 }
 0x2ad   :  { %v1517_v30 = vpop.f32.mrf.mxu0  ;;  %v1588_v32 = vpop.f32.mrf.mxu1 }
 0x2af   :  { %936 = vrot.lane.b32.xlu1 %v860_v13, %s5156_s13  ;;  %v1683_v31 = vpop.f32.mrf.mxu0  ;;  %v1754_v33 = vpop.f32.mrf.mxu1  ;;  %v5512_v13 = vmul.f32 %v5490_v6, %v5487_v5 }
 0x2b0   :  { %1425 = vrot.lane.b32.xlu0 %v1349_v25, %s5158_s15  ;;  %v5540_v25 = vsel %vm185_vm12, 1.0, %v6427_v40 }
 0x2b1   :  { %v1756_v34 = vpop.f32.mrf.mxu1  ;;  %v1685_v35 = vpop.f32.mrf.mxu0 }
 0x2b3   :  { %942 = vrot.lane.b32.xlu1 %v933_v15, %s5156_s13 }
 0x2b4   :  { %1429 = vrot.lane.b32.xlu0 %v1420_v27, %s5158_s15  ;;  %v5548_v27 = vsel %vm187_vm13, 1.0, %v6427_v40 }
 0x2b7   :  { %1255 = vrot.lane.b32.xlu1 %v1179_v20, %s5157_s14  ;;  %v5521_v20 = vsel %vm175_vm10, 1.0, %v6427_v40 }
 0x2b8   :  { %1595 = vrot.lane.b32.xlu0 %v1586_v29, %s5159_s1 }
 0x2bb   :  { %1259 = vrot.lane.b32.xlu1 %v1250_v22, %s5157_s14 }
 0x2bc   :  { %1759 = vrot.lane.b32.xlu0 %v1683_v31, %s5160_s2 }
 0x2bf   :  { %1423 = vrot.lane.b32.xlu1 %v1347_v24, %s5158_s15  ;;  %v5537_v24 = vmul.f32 %v5501_v9, %v5487_v5 }
 0x2c0   :  { %1763 = vrot.lane.b32.xlu0 %v1754_v33, %s5160_s2 }
 0x2c3   :  { %1427 = vrot.lane.b32.xlu1 %v1418_v26, %s5158_s15 }
 0x2c4   :  { %1765 = vrot.lane.b32.xlu0 %v1756_v34, %s5160_s2 }
 0x2c7   :  { %1591 = vrot.lane.b32.xlu1 %v1515_v28, %s5159_s1  ;;  %v5552_v28 = vmul.f32 %v5515_v14, %v5494_v7 }
 0x2c9   :  { %6430 = vst [vmem:[#allocation2_spill] sm:$0xff] %v5552_v28 }
 0x2cb   :  { %1593 = vrot.lane.b32.xlu1 %v1517_v30, %s5159_s1 }
 0x2cf   :  { %1761 = vrot.lane.b32.xlu1 %v1685_v35, %s5160_s2 }
 0x2d3   :  { %1597 = vrot.lane.b32.xlu1 %v1588_v32, %s5159_s1 }
 0x301   :  { %v5445_v36 = vpop.permute.xlu1 %436  ;;  %v5447_v37 = vpop.permute.xlu0 %432 }
 0x305   :  { %v435_v38 = vpop.permute.xlu1 %434 }
 0x306   :  { %v5449_v39 = vpop.permute.xlu0 %604  ;;  %v443_v15 = vsel %vm440_vm9, %v5447_v37, %v435_v38  ;;  %v442_v22 = vsel %vm440_vm9, %v435_v38, %v5445_v36 }
 0x307   :  { %v446_v30 = vmul.f32 %v5508_v12, %v443_v15  ;;  %v447_v34 = vmul.f32 %v442_v22, %v5512_v13 }
 0x309   :  { %v5451_v41 = vpop.permute.xlu1 %438 }
 0x30a   :  { %v5453_v42 = vpop.permute.xlu0 %772  ;;  %v444_v31 = vsel %vm440_vm9, %v5451_v41, %v5447_v37  ;;  %v441_v35 = vsel %vm440_vm9, %v5445_v36, %v5451_v41 }
 0x30b   :  { %v445_v55 = vmul.f32 %v444_v31, %v5525_v21  ;;  %v448_v61 = vmul.f32 %v5521_v20, %v441_v35 }
 0x30d   :  { %v5455_v43 = vpop.permute.xlu1 %600 }
 0x30e   :  { %v5457_v44 = vpop.permute.xlu0 %770 }
 0x30f   :  { %v778_v51 = vsel %vm776_vm14, %v5457_v44, %v5453_v42 }
 0x310   :  { %v783_v63 = vmul.f32 %v778_v51, %v5537_v24 }
 0x311   :  { %v5459_v46 = vpop.permute.xlu1 %606 }
 0x312   :  { %v5461_v47 = vpop.permute.xlu0 %940  ;;  %v612_v23 = vsel %vm608_vm11, %v5459_v46, %v5455_v43  ;;  %v609_v57 = vsel %vm608_vm11, %v5449_v39, %v5459_v46 }
 0x313   :  { %v613_v38 = vmul.f32 %v5494_v7, %v612_v23 }
 0x315   :  { %v5465_v49 = vpop.permute.xlu1 %602  ;;  %v617_v46 = vadd.f32 %v613_v38, %v445_v55 }
 0x316   :  { %v5467_v50 = vpop.permute.xlu0 %938  ;;  %v610_v26 = vsel %vm608_vm11, %v5465_v49, %v5449_v39 }
 0x317   :  { %v615_v54 = vmul.f32 %v5487_v5, %v610_v26 }
 0x319   :  { %v5470_v52 = vpop.permute.xlu1 %768  ;;  %v619_v15 = vadd.f32 %v615_v54, %v447_v34  ;;  %v5623_v34 = vsel %vm5562_vm1, 1.0, %v6427_v40 }
 0x31a   :  { %v5472_v53 = vpop.permute.xlu0 %1257  ;;  %v779_v36 = vsel %vm776_vm14, %v5470_v52, %v5457_v44  ;;  %v611_v44 = vsel %vm608_vm11, %v5455_v43, %v5465_v49  ;;  %v946_v43 = vsel %vm944_vm15, %v5467_v50, %v5461_v47  ;;  %v5640_v51 = vmul.f32 %v5508_v12, %v5623_v34 }
 0x31b   :  { %v782_v1 = vmul.f32 %v5540_v25, %v779_v36  ;;  %v618_v22 = vadd.f32 %v611_v44, %v446_v30  ;;  %v787_v35 = vadd.f32 %v783_v63, %v619_v15  ;;  %v5643_v36 = vsel %vm163_vm3, 1.0, %v6427_v40 }
 0x31c   :  { %v5680_v15 = vmul.f32 %v5540_v25, %v5623_v34 }
 0x31d   :  { %v775_v58 = vpop.permute.xlu1 %774 }
 0x31e   :  { %v5479_v59 = vpop.permute.xlu0 %1261  ;;  %v780_v32 = vsel %vm776_vm14, %v775_v58, %v5470_v52  ;;  %v777_v37 = vsel %vm776_vm14, %v5453_v42, %v775_v58 }
 0x31f   :  { %v781_v58 = vmul.f32 %v780_v32, %v5552_v28  ;;  %v784_v52 = vmul.f32 %v5548_v27, %v777_v37 }
 0x321   :  { %v937_v0 = vpop.permute.xlu1 %936  ;;  %v785_v23 = vadd.f32 %v781_v58, %v617_v46 }
 0x322   :  { %v5482_v2 = vpop.permute.xlu0 %1425  ;;  %v947_v39 = vsel %vm944_vm15, %v937_v0, %v5467_v50  ;;  %v951_v50 = vmul.f32 %v5490_v6, %v946_v43 }
 0x325   :  { %v943_v4 = vpop.permute.xlu1 %942 }
 0x326   :  { %v5505_v11 = vpop.permute.xlu0 %1429  ;;  %v948_v41 = vsel %vm944_vm15, %v943_v4, %v937_v0  ;;  %v945_v42 = vsel %vm944_vm15, %v5461_v47, %v943_v4  ;;  %v620_v4 = vadd.f32 %v609_v57, %v448_v61  ;;  %v950_v0 = vmul.f32 %v5508_v12, %v947_v39 }
 0x327   :  { %v949_v3 = vmul.f32 %v5497_v8, %v948_v41  ;;  %v952_v49 = vmul.f32 %v5521_v20, %v945_v42  ;;  %v786_v47 = vadd.f32 %v782_v1, %v618_v22  ;;  %v955_v61 = vadd.f32 %v951_v50, %v787_v35 }
 0x328   :  { %v788_v32 = vadd.f32 %v784_v52, %v620_v4  ;;  %v5663_v39 = vmul.f32 %v5521_v20, %v5643_v36 }
 0x329   :  { %v5503_v10 = vpop.permute.xlu1 %1255  ;;  %v953_v30 = vadd.f32 %v949_v3, %v785_v23  ;;  %v954_v62 = vadd.f32 %v950_v0, %v786_v47 }
 0x32a   :  { %v5575_v45 = vpop.permute.xlu0 %1595  ;;  %v956_v38 = vadd.f32 %v952_v49, %v788_v32  ;;  %v1266_v37 = vsel %vm1263_vm2, %v5503_v10, %v5472_v53  ;;  %v1267_v33 = vsel %vm1263_vm2, %v5479_v59, %v5503_v10  ;;  %v1106_v49 = vadd.f32 %v5416_v17, %v955_v61 }
 0x32b   :  { %v1104_v10 = vadd.f32 %v5414_v16, %v953_v30  ;;  %v1268_v55 = vmul.f32 %v5515_v14, %v1266_v37  ;;  %v1271_v52 = vmul.f32 %v5548_v27, %v1267_v33 }
 0x32c   :  { %v1107_v44 = vadd.f32 %v5421_v19, %v956_v38 }
 0x32d   :  { %v1260_v29 = vpop.permute.xlu1 %1259  ;;  %v1272_v1 = vadd.f32 %v1268_v55, %v1104_v10 }
 0x32e   :  { %v5616_v31 = vpop.permute.xlu0 %1759  ;;  %v1265_v56 = vsel %vm1263_vm2, %v5472_v53, %v1260_v29  ;;  %v1264_v57 = vsel %vm1263_vm2, %v1260_v29, %v5479_v59  ;;  %v1275_v43 = vadd.f32 %v1271_v52, %v1107_v44 }
 0x32f   :  { %v1269_v58 = vmul.f32 %v5540_v25, %v1265_v56  ;;  %v1270_v59 = vmul.f32 %v5501_v9, %v1264_v57 }
 0x331   :  { %v1424_v60 = vpop.permute.xlu1 %1423  ;;  %v1274_v47 = vadd.f32 %v1270_v59, %v1106_v49  ;;  %v1833_v49 = vld [vmem:[%s6421_s5] sm:$0xff] }
 0x332   :  { %v1434_v41 = vsel %vm1431_vm4, %v1424_v60, %v5482_v2  ;;  %v1764_v42 = vpop.permute.xlu0 %1763  ;;  %v1435_v29 = vsel %vm1431_vm4, %v5505_v11, %v1424_v60 }
 0x333   :  { %v1436_v16 = vmul.f32 %v5497_v8, %v1434_v41 }
 0x335   :  { %v1428_v26 = vpop.permute.xlu1 %1427  ;;  %v1440_v0 = vadd.f32 %v1436_v16, %v1272_v1 }
 0x336   :  { %v1433_v53 = vsel %vm1431_vm4, %v5482_v2, %v1428_v26  ;;  %v1105_v2 = vadd.f32 %v5419_v18, %v954_v62  ;;  %v1432_v19 = vsel %vm1431_vm4, %v1428_v26, %v5505_v11  ;;  %v1439_v11 = vmul.f32 %v1435_v29, %v5663_v39  ;;  %v1766_v26 = vpop.permute.xlu0 %1765 }
 0x337   :  { %v1437_v46 = vmul.f32 %v1433_v53, %v5640_v51  ;;  %v1438_v22 = vmul.f32 %v5490_v6, %v1432_v19  ;;  %v1768_v50 = vsel %vm1767_vm6, %v1764_v42, %v1766_v26  ;;  %v5699_v62 = vmul.f32 %v5548_v27, %v5643_v36 }
 0x338   :  { %v1273_v3 = vadd.f32 %v1269_v58, %v1105_v2  ;;  %v1443_v33 = vadd.f32 %v1439_v11, %v1275_v43  ;;  %v1771_v57 = vsel %vm1767_vm6, %v1766_v26, %v5616_v31  ;;  %v1774_v58 = vmul.f32 %v5501_v9, %v1768_v50 }
 0x339   :  { %v1592_v54 = vpop.permute.xlu1 %1591  ;;  %v1442_v10 = vadd.f32 %v1438_v22, %v1274_v47 }
 0x33a   :  { %v1441_v23 = vadd.f32 %v1437_v46, %v1273_v3  ;;  %v1775_v46 = vmul.f32 %v1771_v57, %v5699_v62 }
 0x33d   :  { %v1594_v63 = vpop.permute.xlu1 %1593 }
 0x33e   :  { %v1601_v18 = vsel %vm1599_vm5, %v1594_v63, %v5575_v45  ;;  %v1602_v60 = vsel %vm1599_vm5, %v1592_v54, %v1594_v63 }
 0x33f   :  { %v1605_v4 = vmul.f32 %v5623_v34, %v1601_v18  ;;  %v1608_v35 = vadd.f32 %v1602_v60, %v1440_v0 }
 0x341   :  { %v1762_v32 = vpop.permute.xlu1 %1761  ;;  %v1609_v38 = vadd.f32 %v1605_v4, %v1441_v23 }
 0x342   :  { %v1769_v17 = vsel %vm1767_vm6, %v1762_v32, %v1764_v42  ;;  %v1770_v30 = vsel %vm1767_vm6, %v5616_v31, %v1762_v32 }
 0x343   :  { %v1772_v37 = vmul.f32 %v5515_v14, %v1770_v30  ;;  %v1773_v56 = vmul.f32 %v1769_v17, %v5680_v15 }
 0x345   :  { %v1776_v41 = vadd.f32 %v1772_v37, %v1608_v35  ;;  %v1777_v53 = vadd.f32 %v1773_v56, %v1609_v38  ;;  %v1598_v55 = vpop.permute.xlu1 %1597 }
 0x346   :  { %v1600_v42 = vsel %vm1599_vm5, %v5575_v45, %v1598_v55  ;;  %v1603_v61 = vsel %vm1599_vm5, %v1598_v55, %v1592_v54 }
 0x347   :  { %v1784_v44 = vrot.slane %v1776_v41, 4  ;;  %v1785_v52 = vrot.slane %v1777_v53, 4  ;;  %v1607_v2 = vmul.f32 %v5643_v36, %v1603_v61  ;;  %v1610_v16 = vadd.f32 %v1600_v42, %v1442_v10  ;;  %v1820_v41 = vld [vmem:[%s6422_s4] sm:$0xff] }
 0x349   :  { %1792 = vst [vmem:[%s6417_s10] sm:$0xf0] %v1784_v44  ;;  %1793 = vst [vmem:[%s6417_s10 + $0x8] sm:$0xf0] %v1785_v52  ;;  %v1611_v31 = vadd.f32 %v1607_v2, %v1443_v33  ;;  %v1778_v45 = vadd.f32 %v1774_v58, %v1610_v16 }
 0x34b   :  { %v1779_v63 = vadd.f32 %v1775_v46, %v1611_v31  ;;  %v1786_v59 = vrot.slane %v1778_v45, 4 }
 0x34d   :  { %v1787_v54 = vrot.slane %v1779_v63, 4  ;;  %1794 = vst [vmem:[%s6417_s10 + $0x10] sm:$0xf0] %v1786_v59 }
 0x34f   :  { %1795 = vst [vmem:[%s6417_s10 + $0x18] sm:$0xf0] %v1787_v54  ;;  %v1847_v54 = vld [vmem:[%s6423_s6] sm:$0xf] }
 0x350   :  { %v5727_v29 = vld [vmem:[%s6417_s10] sm:$0xff]  ;;  %v5732_v19 = vld [vmem:[%s6417_s10 + $0x8] sm:$0xff] }
 0x351   :  { %v1800_v18 = vadd.f32 %v5732_v19, %v5727_v29 }
 0x354   :  { %v5739_v1 = vld [vmem:[%s6417_s10 + $0x10] sm:$0xff] }
 0x355   :  { %v1801_v3 = vadd.f32 %v1800_v18, %v5739_v1  ;;  %v5043_v18 = vld [vmem:[%s6423_s6 + $0x4] sm:$0xf] }
 0x356   :  { %v5745_v4 = vld [vmem:[%s6417_s10 + $0x18] sm:$0xff] }
 0x357   :  { %v5748_v43 = vadd.f32 %v1801_v3, %v5745_v4  ;;  %v5046_v3 = vld [vmem:[%s6423_s6 + $0x8] sm:$0xf] }
 0x359   :  { %1803 = vadd.xlane.f32.xlu1 %v5748_v43 }
 0x36a   :  { %1836 = vperm.xlu1 %5139, %v1833_v49   ;;  %v5049_v49 = vld [vmem:[%s6423_s6 + $0xc] sm:$0xf] }
 0x3e2   :  { %v1804_v60 = vpop.xlane.xlu1 %1803 }
 0x3e3   :  { %v1805_v11 = vmul.f32 0.001953125, %v1804_v60  ;;  %v5052_v60 = vld [vmem:[%s6423_s6 + $0x10] sm:$0xf] }
 0x3e5   :  { %v1806_v22 = vsub.f32 %v5727_v29, %v1805_v11  ;;  %v1807_v23 = vsub.f32 %v5732_v19, %v1805_v11  ;;  %v1808_v0 = vsub.f32 %v5739_v1, %v1805_v11  ;;  %v1809_v26 = vsub.f32 %v5745_v4, %v1805_v11  ;;  %v5055_v11 = vld [vmem:[%s6423_s6 + $0x14] sm:$0xf] }
 0x3e6   :  { %v1837_v44 = vpop.permute.xlu1 %1836 }
 0x3e7   :  { %v1810_v32 = vmul.f32 %v1806_v22, %v1806_v22  ;;  %v1811_v47 = vmul.f32 %v1807_v23, %v1807_v23  ;;  %v1812_v50 = vmul.f32 %v1808_v0, %v1808_v0  ;;  %v1813_v30 = vmul.f32 %v1809_v26, %v1809_v26 }
 0x3e9   :  { %v1814_v17 = vadd.f32 %v1811_v47, %v1810_v32 }
 0x3eb   :  { %v1815_v35 = vadd.f32 %v1814_v17, %v1812_v50 }
 0x3ed   :  { %v1816_v38 = vadd.f32 %v1815_v35, %v1813_v30 }
 0x3ef   :  { %1817 = vadd.xlane.f32.xlu0 %v1816_v38 }
 0x478   :  { %v1818_v37 = vpop.xlane.xlu0 %1817 }
 0x479   :  { %v1819_v56 = vmul.f32 0.001953125, %v1818_v37 }
 0x47b   :  { %v1821_v33 = vadd.f32 1e-05, %v1819_v56 }
 0x47d   :  { %5145 = vrsqrt.f32 %v1821_v33 }
 0x48a   :  { %v5146_v53 = vpop.eup %5145 }
 0x48b   :  { %v1823_v10 = vmul.f32 %v5146_v53, %v1820_v41 }
 0x48d   :  { %1826 = vperm.xlu0 %5140, %v1823_v10  }
 0x508   :  { %v1827_v55 = vpop.permute.xlu0 %1826 }
 0x509   :  { %v1829_v57 = vmul.f32 %v1827_v55, %v1806_v22  ;;  %v1830_v58 = vmul.f32 %v1827_v55, %v1807_v23  ;;  %v1831_v42 = vmul.f32 %v1827_v55, %v1808_v0  ;;  %v1832_v61 = vmul.f32 %v1827_v55, %v1809_v26  ;;  %v5058_v22 = vld [vmem:[%s6423_s6 + $0x18] sm:$0xf]  ;;  %v5061_v23 = vld [vmem:[%s6423_s6 + $0x1c] sm:$0xf]  ;;  %v5064_v0 = vld [vmem:[%s6423_s6 + $0x20] sm:$0xf] }
 0x50b   :  { %v1839_v52 = vadd.f32 %v1837_v44, %v1829_v57  ;;  %v1840_v2 = vadd.f32 %v1837_v44, %v1830_v58  ;;  %v1841_v16 = vadd.f32 %v1837_v44, %v1831_v42  ;;  %v1842_v46 = vadd.f32 %v1837_v44, %v1832_v61 }
 0x50d   :  { %v5761_v31 = vmax.f32 %v1839_v52, 0.0  ;;  %v5763_v45 = vmax.f32 %v1840_v2, 0.0  ;;  %v5765_v63 = vmax.f32 %v1841_v16, 0.0  ;;  %v5767_v59 = vmax.f32 %v1842_v46, 0.0 }
 0x50f   :  { %1882 = vmatprep.subr.mxu0 %v5763_v45  ;;  %1953 = vmatprep.subr.mxu1 %v5767_v59 }
 0x510   :  { %1883 = vmatpush1.msra.mxu0 %v5761_v31  ;;  %1954 = vmatpush1.msra.mxu1 %v5765_v63 }
 0x511   :  { %5041 = vmatmul.mubr.msk.f32.vlgmr.msra.gmra.mxu0 %vm1848_vm7, %v1847_v54  ;;  %5042 = vmatmul.mubr.msk.f32.vlgmr.msra.gmra.mxu1 %vm1848_vm7, %v1847_v54 }
 0x512   :  { %2049 = vmatprep.subr.mxu0 %v5763_v45  ;;  %2120 = vmatprep.subr.mxu1 %v5767_v59 }
 0x513   :  { %2050 = vmatpush1.msra.mxu0 %v5761_v31  ;;  %2121 = vmatpush1.msra.mxu1 %v5765_v63 }
 0x514   :  { %2216 = vmatprep.subr.mxu0 %v5763_v45  ;;  %2287 = vmatprep.subr.mxu1 %v5767_v59 }
 0x515   :  { %2083 = vmatprep.mubr.f32.mxu0 %v6427_v40  ;;  %2154 = vmatprep.mubr.f32.mxu1 %v6427_v40 }
 0x516   :  { %5044 = vmatmul.mubr.msk.f32.vlgmr.msra.gmra.mxu0 %vm1848_vm7, %v5043_v18  ;;  %5045 = vmatmul.mubr.msk.f32.vlgmr.msra.gmra.mxu1 %vm1848_vm7, %v5043_v18 }
 0x517   :  { %2217 = vmatpush1.msra.mxu0 %v5761_v31  ;;  %2288 = vmatpush1.msra.mxu1 %v5765_v63 }
 0x518   :  { %2383 = vmatprep.subr.mxu0 %v5763_v45  ;;  %2454 = vmatprep.subr.mxu1 %v5767_v59 }
 0x519   :  { %2250 = vmatprep.mubr.f32.mxu0 %v6427_v40  ;;  %2321 = vmatprep.mubr.f32.mxu1 %v6427_v40 }
 0x51a   :  { %5047 = vmatmul.mubr.msk.f32.vlgmr.msra.gmra.mxu0 %vm1848_vm7, %v5046_v3  ;;  %5048 = vmatmul.mubr.msk.f32.vlgmr.msra.gmra.mxu1 %vm1848_vm7, %v5046_v3 }
 0x51b   :  { %2384 = vmatpush1.msra.mxu0 %v5761_v31  ;;  %2455 = vmatpush1.msra.mxu1 %v5765_v63 }
 0x51c   :  { %2550 = vmatprep.subr.mxu0 %v5763_v45  ;;  %2621 = vmatprep.subr.mxu1 %v5767_v59 }
 0x51d   :  { %2417 = vmatprep.mubr.f32.mxu0 %v6427_v40  ;;  %2488 = vmatprep.mubr.f32.mxu1 %v6427_v40 }
 0x51e   :  { %5050 = vmatmul.mubr.msk.f32.vlgmr.msra.gmra.mxu0 %vm1848_vm7, %v5049_v49  ;;  %5051 = vmatmul.mubr.msk.f32.vlgmr.msra.gmra.mxu1 %vm1848_vm7, %v5049_v49 }
 0x51f   :  { %2551 = vmatpush1.msra.mxu0 %v5761_v31  ;;  %2622 = vmatpush1.msra.mxu1 %v5765_v63 }
 0x520   :  { %2701 = vmatprep.subr.mxu0 %v5763_v45  ;;  %2772 = vmatprep.subr.mxu1 %v5767_v59 }
 0x521   :  { %2584 = vmatprep.mubr.f32.mxu0 %v6427_v40  ;;  %2655 = vmatprep.mubr.f32.mxu1 %v6427_v40 }
 0x522   :  { %5053 = vmatmul.mubr.msk.f32.vlgmr.msra.gmra.mxu0 %vm1848_vm7, %v5052_v60  ;;  %5054 = vmatmul.mubr.msk.f32.vlgmr.msra.gmra.mxu1 %vm1848_vm7, %v5052_v60 }
 0x523   :  { %2702 = vmatpush1.msra.mxu0 %v5761_v31  ;;  %2773 = vmatpush1.msra.mxu1 %v5765_v63 }
 0x524   :  { %2868 = vmatprep.subr.mxu0 %v5763_v45  ;;  %2939 = vmatprep.subr.mxu1 %v5767_v59 }
 0x525   :  { %2735 = vmatprep.mubr.f32.mxu0 %v6427_v40  ;;  %2806 = vmatprep.mubr.f32.mxu1 %v6427_v40 }
 0x526   :  { %5056 = vmatmul.mubr.msk.f32.vlgmr.msra.gmra.mxu0 %vm1848_vm7, %v5055_v11  ;;  %5057 = vmatmul.mubr.msk.f32.vlgmr.msra.gmra.mxu1 %vm1848_vm7, %v5055_v11 }
 0x527   :  { %2869 = vmatpush1.msra.mxu0 %v5761_v31  ;;  %2940 = vmatpush1.msra.mxu1 %v5765_v63 }
 0x528   :  { %3035 = vmatprep.subr.mxu0 %v5763_v45  ;;  %3106 = vmatprep.subr.mxu1 %v5767_v59 }
 0x529   :  { %2902 = vmatprep.mubr.f32.mxu0 %v6427_v40  ;;  %2973 = vmatprep.mubr.f32.mxu1 %v6427_v40 }
 0x52a   :  { %5059 = vmatmul.mubr.msk.f32.vlgmr.msra.gmra.mxu0 %vm1848_vm7, %v5058_v22  ;;  %5060 = vmatmul.mubr.msk.f32.vlgmr.msra.gmra.mxu1 %vm1848_vm7, %v5058_v22 }
 0x52b   :  { %3036 = vmatpush1.msra.mxu0 %v5761_v31  ;;  %3107 = vmatpush1.msra.mxu1 %v5765_v63 }
 0x52c   :  { %3202 = vmatprep.subr.mxu0 %v5763_v45  ;;  %3273 = vmatprep.subr.mxu1 %v5767_v59 }
 0x52d   :  { %3069 = vmatprep.mubr.f32.mxu0 %v6427_v40  ;;  %3140 = vmatprep.mubr.f32.mxu1 %v6427_v40 }
 0x52e   :  { %5062 = vmatmul.mubr.msk.f32.vlgmr.msra.gmra.mxu0 %vm1848_vm7, %v5061_v23  ;;  %5063 = vmatmul.mubr.msk.f32.vlgmr.msra.gmra.mxu1 %vm1848_vm7, %v5061_v23 }
 0x52f   :  { %3203 = vmatpush1.msra.mxu0 %v5761_v31  ;;  %3274 = vmatpush1.msra.mxu1 %v5765_v63 }
 0x530   :  { %3236 = vmatprep.mubr.f32.mxu0 %v6427_v40  ;;  %3307 = vmatprep.mubr.f32.mxu1 %v6427_v40 }
 0x532   :  { %5065 = vmatmul.mubr.msk.f32.vlgmr.msra.gmra.mxu0 %vm1848_vm7, %v5064_v0  ;;  %5066 = vmatmul.mubr.msk.f32.vlgmr.msra.gmra.mxu1 %vm1848_vm7, %v5064_v0 }
 0x533   :  { %3529 = vmatprep.mubr.f32.mxu0 %v6427_v40  ;;  %3600 = vmatprep.mubr.f32.mxu1 %v6427_v40 }
 0x5d1   :  { %v1918_v26 = vpop.f32.mrf.mxu0  ;;  %v1989_v32 = vpop.f32.mrf.mxu1 }
 0x5d2   :  { %1994 = vrot.lane.b32.xlu1 %v1918_v26, %s5153_s11 }
 0x5d3   :  { %v1920_v47 = vpop.f32.mrf.mxu0  ;;  %v1991_v50 = vpop.f32.mrf.mxu1 }
 0x5d6   :  { %1998 = vrot.lane.b32.xlu1 %v1989_v32, %s5153_s11  ;;  %v2085_v17 = vpop.f32.mrf.mxu0  ;;  %v2156_v30 = vpop.f32.mrf.mxu1 }
 0x5d8   :  { %v2087_v35 = vpop.f32.mrf.mxu0  ;;  %v2158_v38 = vpop.f32.mrf.mxu1 }
 0x5d9   :  { %2163 = vrot.lane.b32.xlu0 %v2087_v35, %s5154_s3 }
 0x5da   :  { %1996 = vrot.lane.b32.xlu1 %v1920_v47, %s5153_s11  ;;  %v2252_v37 = vpop.f32.mrf.mxu0  ;;  %v2323_v56 = vpop.f32.mrf.mxu1 }
 0x5dc   :  { %v2254_v33 = vpop.f32.mrf.mxu0  ;;  %v2325_v41 = vpop.f32.mrf.mxu1 }
 0x5dd   :  { %2328 = vrot.lane.b32.xlu0 %v2252_v37, %s5155_s12 }
 0x5de   :  { %2000 = vrot.lane.b32.xlu1 %v1991_v50, %s5153_s11  ;;  %v2419_v53 = vpop.f32.mrf.mxu0  ;;  %v2490_v55 = vpop.f32.mrf.mxu1  ;;  %v3421_v50 = vld [vmem:[%s6424_s8 + $0x8] sm:$0xf] }
 0x5e0   :  { %v2421_v10 = vpop.f32.mrf.mxu0  ;;  %v2492_v58 = vpop.f32.mrf.mxu1 }
 0x5e1   :  { %2334 = vrot.lane.b32.xlu0 %v2325_v41, %s5155_s12 }
 0x5e2   :  { %2161 = vrot.lane.b32.xlu1 %v2085_v17, %s5154_s3  ;;  %v5876_v57 = vpop.f32.mrf.mxu0  ;;  %v5882_v61 = vpop.f32.mrf.mxu1 }
 0x5e4   :  { %v5880_v42 = vpop.f32.mrf.mxu0  ;;  %v5886_v52 = vpop.f32.mrf.mxu1 }
 0x5e5   :  { %2495 = vrot.lane.b32.xlu0 %v2419_v53, %s5156_s13 }
 0x5e6   :  { %2165 = vrot.lane.b32.xlu1 %v2156_v30, %s5154_s3  ;;  %v2737_v44 = vpop.f32.mrf.mxu0  ;;  %v2808_v2 = vpop.f32.mrf.mxu1 }
 0x5e8   :  { %v2739_v16 = vpop.f32.mrf.mxu0  ;;  %v2810_v31 = vpop.f32.mrf.mxu1 }
 0x5e9   :  { %2501 = vrot.lane.b32.xlu0 %v2492_v58, %s5156_s13 }
 0x5ea   :  { %2167 = vrot.lane.b32.xlu1 %v2158_v38, %s5154_s3  ;;  %v2904_v46 = vpop.f32.mrf.mxu0  ;;  %v2975_v63 = vpop.f32.mrf.mxu1 }
 0x5ec   :  { %v2906_v45 = vpop.f32.mrf.mxu0  ;;  %v2977_v3 = vpop.f32.mrf.mxu1 }
 0x5ed   :  { %2813 = vrot.lane.b32.xlu0 %v2737_v44, %s5157_s14 }
 0x5ee   :  { %2332 = vrot.lane.b32.xlu1 %v2323_v56, %s5155_s12  ;;  %v3071_v59 = vpop.f32.mrf.mxu0  ;;  %v3142_v60 = vpop.f32.mrf.mxu1 }
 0x5f0   :  { %v3073_v54 = vpop.f32.mrf.mxu0  ;;  %v3144_v11 = vpop.f32.mrf.mxu1 }
 0x5f1   :  { %2817 = vrot.lane.b32.xlu0 %v2808_v2, %s5157_s14 }
 0x5f2   :  { %2330 = vrot.lane.b32.xlu1 %v2254_v33, %s5155_s12  ;;  %v3238_v18 = vpop.f32.mrf.mxu0  ;;  %v3309_v22 = vpop.f32.mrf.mxu1 }
 0x5f4   :  { %v3240_v49 = vpop.f32.mrf.mxu0  ;;  %v3311_v23 = vpop.f32.mrf.mxu1 }
 0x5f5   :  { %2980 = vrot.lane.b32.xlu0 %v2904_v46, %s5158_s15 }
 0x5f6   :  { %2499 = vrot.lane.b32.xlu1 %v2490_v55, %s5156_s13 }
 0x5f9   :  { %2984 = vrot.lane.b32.xlu0 %v2975_v63, %s5158_s15 }
 0x5fa   :  { %2497 = vrot.lane.b32.xlu1 %v2421_v10, %s5156_s13 }
 0x5fd   :  { %3147 = vrot.lane.b32.xlu0 %v3071_v59, %s5159_s1 }
 0x5fe   :  { %2815 = vrot.lane.b32.xlu1 %v2739_v16, %s5157_s14 }
 0x601   :  { %3149 = vrot.lane.b32.xlu0 %v3073_v54, %s5159_s1 }
 0x602   :  { %2819 = vrot.lane.b32.xlu1 %v2810_v31, %s5157_s14 }
 0x605   :  { %3316 = vrot.lane.b32.xlu0 %v3240_v49, %s5160_s2 }
 0x606   :  { %2982 = vrot.lane.b32.xlu1 %v2906_v45, %s5158_s15 }
 0x609   :  { %3153 = vrot.lane.b32.xlu0 %v3144_v11, %s5159_s1 }
 0x60a   :  { %2986 = vrot.lane.b32.xlu1 %v2977_v3, %s5158_s15 }
 0x60e   :  { %3151 = vrot.lane.b32.xlu1 %v3142_v60, %s5159_s1 }
 0x612   :  { %3314 = vrot.lane.b32.xlu1 %v3238_v18, %s5160_s2 }
 0x616   :  { %3318 = vrot.lane.b32.xlu1 %v3309_v22, %s5160_s2 }
 0x61a   :  { %3320 = vrot.lane.b32.xlu1 %v3311_v23, %s5160_s2 }
 0x63e   :  { %3349 = vadd.xlane.f32.xlu1 %v5748_v43 }
 0x644   :  { %v1995_v0 = vpop.permute.xlu1 %1994 }
 0x648   :  { %v1999_v26 = vpop.permute.xlu1 %1998 }
 0x64b   :  { %v2164_v32 = vpop.permute.xlu0 %2163 }
 0x64c   :  { %v1997_v47 = vpop.permute.xlu1 %1996 }
 0x64d   :  { %v2004_v3 = vsel %vm440_vm9, %v1995_v0, %v1997_v47 }
 0x64f   :  { %3429 = vperm.xlu1 %5139, %v3421_v50   ;;  %v2329_v17 = vpop.permute.xlu0 %2328 }
 0x650   :  { %v2001_v30 = vpop.permute.xlu1 %2000 }
 0x651   :  { %v2005_v31 = vsel %vm440_vm9, %v2001_v30, %v1995_v0 }
 0x652   :  { %v2006_v59 = vmul.f32 %v2005_v31, %v5525_v21  ;;  %v2002_v31 = vsel %vm440_vm9, %v1999_v26, %v2001_v30 }
 0x653   :  { %v2335_v35 = vpop.permute.xlu0 %2334 }
 0x654   :  { %v2162_v38 = vpop.permute.xlu1 %2161  ;;  %v2339_v63 = vsel %vm776_vm14, %v2335_v35, %v2329_v17 }
 0x655   :  { %v2340_v49 = vmul.f32 %v2339_v63, %v5552_v28  ;;  %v2171_v23 = vsel %vm608_vm11, %v2162_v38, %v2164_v32 }
 0x657   :  { %v2496_v37 = vpop.permute.xlu0 %2495 }
 0x658   :  { %v2166_v56 = vpop.permute.xlu1 %2165 }
 0x659   :  { %v2170_v0 = vsel %vm608_vm11, %v2164_v32, %v2166_v56 }
 0x65a   :  { %v2175_v32 = vmul.f32 %v5487_v5, %v2170_v0 }
 0x65b   :  { %v2502_v33 = vpop.permute.xlu0 %2501 }
 0x65c   :  { %v2168_v41 = vpop.permute.xlu1 %2167  ;;  %v2506_v11 = vsel %vm944_vm15, %v2502_v33, %v2496_v37 }
 0x65d   :  { %v2172_v2 = vsel %vm608_vm11, %v2168_v41, %v2162_v38 }
 0x65e   :  { %v2173_v45 = vmul.f32 %v5494_v7, %v2172_v2  ;;  %v2007_v2 = vmul.f32 %v5508_v12, %v2004_v3  ;;  %v2003_v3 = vsel %vm440_vm9, %v1997_v47, %v1999_v26 }
 0x65f   :  { %v5912_v53 = vpop.permute.xlu0 %2813 }
 0x660   :  { %v2333_v43 = vpop.permute.xlu1 %2332  ;;  %v2177_v60 = vadd.f32 %v2173_v45, %v2006_v59  ;;  %v2507_v59 = vmul.f32 %v5497_v8, %v2506_v11  ;;  %v2178_v28 = vadd.f32 %v2171_v23, %v2007_v2  ;;  %v2009_v11 = vmul.f32 %v5521_v20, %v2002_v31 }
 0x662   :  { %v2344_v63 = vadd.f32 %v2340_v49, %v2177_v60 }
 0x663   :  { %v5914_v10 = vpop.permute.xlu0 %2817 }
 0x664   :  { %v2331_v55 = vpop.permute.xlu1 %2330 }
 0x665   :  { %v2338_v22 = vsel %vm776_vm14, %v2329_v17, %v2331_v55  ;;  %v2336_v17 = vsel %vm776_vm14, %v2333_v43, %v2335_v35  ;;  %v2337_v30 = vsel %vm776_vm14, %v2331_v55, %v2333_v43  ;;  %v2008_v43 = vmul.f32 %v2003_v3, %v5512_v13 }
 0x666   :  { %v2341_v38 = vmul.f32 %v5540_v25, %v2338_v22  ;;  %v2343_v22 = vmul.f32 %v5548_v27, %v2336_v17 }
 0x667   :  { %v5916_v58 = vpop.permute.xlu0 %2980  ;;  %v2179_v31 = vadd.f32 %v2175_v32, %v2008_v43 }
 0x668   :  { %v2500_v44 = vpop.permute.xlu1 %2499 }
 0x669   :  { %v2503_v49 = vsel %vm944_vm15, %v2500_v44, %v2502_v33  ;;  %v2345_v33 = vadd.f32 %v2341_v38, %v2178_v28 }
 0x66a   :  { %v2510_v23 = vmul.f32 %v5521_v20, %v2503_v49 }
 0x66b   :  { %v5920_v16 = vpop.permute.xlu0 %2984 }
 0x66c   :  { %v2498_v46 = vpop.permute.xlu1 %2497 }
 0x66d   :  { %v2505_v45 = vsel %vm944_vm15, %v2496_v37, %v2498_v46  ;;  %v2169_v37 = vsel %vm608_vm11, %v2166_v56, %v2168_v41  ;;  %v2504_v26 = vsel %vm944_vm15, %v2498_v46, %v2500_v44  ;;  %v2511_v56 = vadd.f32 %v2507_v59, %v2344_v63 }
 0x66e   :  { %v2508_v35 = vmul.f32 %v5508_v12, %v2505_v45  ;;  %v2342_v41 = vmul.f32 %v2337_v30, %v5537_v24  ;;  %v2180_v55 = vadd.f32 %v2169_v37, %v2009_v11  ;;  %v2509_v44 = vmul.f32 %v5490_v6, %v2504_v26 }
 0x66f   :  { %v5928_v18 = vpop.permute.xlu0 %3147  ;;  %v2662_v59 = vadd.f32 %v5876_v57, %v2511_v56 }
 0x670   :  { %v2816_v54 = vpop.permute.xlu1 %2815  ;;  %v2512_v46 = vadd.f32 %v2508_v35, %v2345_v33  ;;  %v2347_v3 = vadd.f32 %v2343_v22, %v2180_v55  ;;  %v2346_v63 = vadd.f32 %v2342_v41, %v2179_v31 }
 0x671   :  { %v2823_v47 = vsel %vm1263_vm2, %v5912_v53, %v2816_v54  ;;  %v2822_v28 = vsel %vm1263_vm2, %v2816_v54, %v5914_v10 }
 0x672   :  { %v2825_v0 = vmul.f32 %v5515_v14, %v2823_v47  ;;  %v2514_v30 = vadd.f32 %v2510_v23, %v2347_v3  ;;  %v2513_v37 = vadd.f32 %v2509_v44, %v2346_v63  ;;  %v2663_v32 = vadd.f32 %v5880_v42, %v2512_v46 }
 0x673   :  { %v3150_v40 = vpop.permute.xlu0 %3149  ;;  %v2826_v11 = vmul.f32 %v5540_v25, %v2822_v28 }
 0x674   :  { %v2820_v50 = vpop.permute.xlu1 %2819  ;;  %v2829_v49 = vadd.f32 %v2825_v0, %v2662_v59  ;;  %v2665_v43 = vadd.f32 %v5886_v52, %v2514_v30 }
 0x675   :  { %v2821_v22 = vsel %vm1263_vm2, %v5914_v10, %v2820_v50  ;;  %v2824_v57 = vsel %vm1263_vm2, %v2820_v50, %v5912_v53  ;;  %v3157_v10 = vsel %vm1599_vm5, %v5928_v18, %v3150_v40  ;;  %v2830_v33 = vadd.f32 %v2826_v11, %v2663_v32 }
 0x676   :  { %v2827_v56 = vmul.f32 %v5501_v9, %v2821_v22 }
 0x677   :  { %v3317_v45 = vpop.permute.xlu0 %3316 }
 0x678   :  { %v2983_v60 = vpop.permute.xlu1 %2982 }
 0x679   :  { %v2990_v2 = vsel %vm1431_vm4, %v5916_v58, %v2983_v60  ;;  %v2989_v54 = vsel %vm1431_vm4, %v2983_v60, %v5920_v16  ;;  %v2664_v60 = vadd.f32 %v5882_v61, %v2513_v37 }
 0x67a   :  { %v2992_v38 = vmul.f32 %v5497_v8, %v2990_v2  ;;  %v2993_v41 = vmul.f32 %v2989_v54, %v5640_v51 }
 0x67b   :  { %v3154_v47 = vpop.permute.xlu0 %3153  ;;  %v2831_v44 = vadd.f32 %v2827_v56, %v2664_v60 }
 0x67c   :  { %v2987_v17 = vpop.permute.xlu1 %2986  ;;  %v2996_v26 = vadd.f32 %v2992_v38, %v2829_v49  ;;  %v3158_v23 = vsel %vm1599_vm5, %v3154_v47, %v5928_v18  ;;  %v2997_v0 = vadd.f32 %v2993_v41, %v2830_v33 }
 0x67d   :  { %v2988_v42 = vsel %vm1431_vm4, %v5920_v16, %v2987_v17  ;;  %v2991_v53 = vsel %vm1431_vm4, %v2987_v17, %v5916_v58  ;;  %v2828_v16 = vmul.f32 %v5548_v27, %v2824_v57  ;;  %v3162_v63 = vmul.f32 %v5643_v36, %v3158_v23 }
 0x67e   :  { %v2994_v55 = vmul.f32 %v5490_v6, %v2988_v42  ;;  %v3163_v2 = vadd.f32 %v3157_v10, %v2996_v26 }
 0x67f   :  { %v2832_v46 = vadd.f32 %v2828_v16, %v2665_v43 }
 0x680   :  { %v3152_v35 = vpop.permute.xlu1 %3151  ;;  %v2998_v28 = vadd.f32 %v2994_v55, %v2831_v44 }
 0x681   :  { %v3156_v50 = vsel %vm1599_vm5, %v3150_v40, %v3152_v35  ;;  %v2995_v40 = vmul.f32 %v2991_v53, %v5663_v39  ;;  %v3155_v37 = vsel %vm1599_vm5, %v3152_v35, %v3154_v47 }
 0x682   :  { %v3160_v61 = vmul.f32 %v5623_v34, %v3156_v50  ;;  %v3165_v57 = vadd.f32 %v3155_v37, %v2998_v28 }
 0x683   :  { %v2999_v59 = vadd.f32 %v2995_v40, %v2832_v46 }
 0x684   :  { %v3315_v52 = vpop.permute.xlu1 %3314  ;;  %v3164_v38 = vadd.f32 %v3160_v61, %v2997_v0 }
 0x685   :  { %v3324_v58 = vsel %vm1767_vm6, %v3315_v52, %v3317_v45  ;;  %v3166_v22 = vadd.f32 %v3162_v63, %v2999_v59 }
 0x686   :  { %v3326_v31 = vmul.f32 %v5515_v14, %v3324_v58 }
 0x688   :  { %v3330_v17 = vadd.f32 %v3326_v31, %v3163_v2  ;;  %v3319_v3 = vpop.permute.xlu1 %3318 }
 0x689   :  { %v3323_v18 = vsel %vm1767_vm6, %v3317_v45, %v3319_v3 }
 0x68a   :  { %3334 = vst [vmem:[%s6417_s10 + $0x20] sm:$0xf] %v3330_v17  ;;  %v3327_v30 = vmul.f32 %v3323_v18, %v5680_v15 }
 0x68c   :  { %v3331_v32 = vadd.f32 %v3327_v30, %v3164_v38  ;;  %v3321_v49 = vpop.permute.xlu1 %3320 }
 0x68d   :  { %v3322_v11 = vsel %vm1767_vm6, %v3319_v3, %v3321_v49  ;;  %v3325_v45 = vsel %vm1767_vm6, %v3321_v49, %v3315_v52 }
 0x68e   :  { %3335 = vst [vmem:[%s6417_s10 + $0x28] sm:$0xf] %v3331_v32  ;;  %v3328_v54 = vmul.f32 %v5501_v9, %v3322_v11  ;;  %v3329_v26 = vmul.f32 %v3325_v45, %v5699_v62 }
 0x690   :  { %v3332_v42 = vadd.f32 %v3328_v54, %v3165_v57  ;;  %v3333_v35 = vadd.f32 %v3329_v26, %v3166_v22 }
 0x691   :  { %v3342_v47 = vld [vmem:[%s6417_s10 + $0x20] sm:$0xf] }
 0x692   :  { %3336 = vst [vmem:[%s6417_s10 + $0x30] sm:$0xf] %v3332_v42  ;;  %3337 = vst [vmem:[%s6417_s10 + $0x38] sm:$0xf] %v3333_v35  ;;  %v3351_v53 = vsel %vm216_vm0, %v3342_v47, 0.0 }
 0x695   :  { %v3343_v43 = vld [vmem:[%s6417_s10 + $0x28] sm:$0xf] }
 0x696   :  { %v3352_v10 = vsel %vm216_vm0, %v3343_v43, 0.0 }
 0x697   :  { %v3353_v56 = vadd.f32 %v3352_v10, %v3351_v53 }
 0x699   :  { %v3344_v50 = vld [vmem:[%s6417_s10 + $0x30] sm:$0xf]  ;;  %v3345_v60 = vld [vmem:[%s6417_s10 + $0x38] sm:$0xf] }
 0x69a   :  { %v3354_v16 = vsel %vm216_vm0, %v3344_v50, 0.0  ;;  %v3356_v52 = vsel %vm216_vm0, %v3345_v60, 0.0 }
 0x69b   :  { %v3355_v41 = vadd.f32 %v3354_v16, %v3353_v56  ;;  %v3394_v56 = vld [vmem:[%s6425_s7] sm:$0xff] }
 0x69d   :  { %v3357_v33 = vadd.f32 %v3356_v52, %v3355_v41  ;;  %v3420_v41 = vld [vmem:[%s6424_s8] sm:$0xff] }
 0x69f   :  { %3358 = vadd.xlane.f32.xlu0 %v3357_v33 }
 0x6c7   :  { %v3350_v55 = vpop.xlane.xlu1 %3349 }
 0x6c8   :  { %v3360_v23 = vmul.f32 0.001953125, %v3350_v55 }
 0x6ca   :  { %v6057_v58 = vsub.f32 %v5727_v29, %v3360_v23  ;;  %v6060_v40 = vsub.f32 %v5732_v19, %v3360_v23  ;;  %v3364_v29 = vsub.f32 %v5739_v1, %v3360_v23  ;;  %v3365_v11 = vsub.f32 %v5745_v4, %v3360_v23  ;;  %v3395_v4 = vld [vmem:[%s6425_s7 + $0x8] sm:$0xf] }
 0x6cb   :  { %v3430_v33 = vpop.permute.xlu1 %3429 }
 0x6cc   :  { %v3370_v17 = vmul.f32 %v6057_v58, %v6057_v58  ;;  %v3371_v3 = vmul.f32 %v6060_v40, %v6060_v40  ;;  %v3372_v45 = vmul.f32 %v3364_v29, %v3364_v29  ;;  %v3373_v26 = vmul.f32 %v3365_v11, %v3365_v11 }
 0x6ce   :  { %v3378_v37 = vadd.f32 %v3371_v3, %v3370_v17 }
 0x6d0   :  { %v3379_v54 = vadd.f32 %v3378_v37, %v3372_v45 }
 0x6d2   :  { %v3380_v1 = vadd.f32 %v3379_v54, %v3373_v26  ;;  %v3448_v54 = vld [vmem:[%s6426_s9] sm:$0xf]  ;;  %v5073_v26 = vld [vmem:[%s6426_s9 + $0x4] sm:$0xf] }
 0x728   :  { %v3359_v61 = vpop.xlane.xlu0 %3358 }
 0x729   :  { %v3361_v2 = vmul.f32 0.001953125, %v3359_v61 }
 0x72b   :  { %v3366_v31 = vsub.f32 %v3342_v47, %v3361_v2  ;;  %v3367_v44 = vsub.f32 %v3343_v43, %v3361_v2  ;;  %v3368_v46 = vsub.f32 %v3344_v50, %v3361_v2  ;;  %v3369_v0 = vsub.f32 %v3345_v60, %v3361_v2 }
 0x72d   :  { %v3374_v63 = vmul.f32 %v3366_v31, %v3366_v31  ;;  %v3375_v18 = vmul.f32 %v3367_v44, %v3367_v44  ;;  %v3376_v59 = vmul.f32 %v3368_v46, %v3368_v46  ;;  %v3377_v28 = vmul.f32 %v3369_v0, %v3369_v0 }
 0x72f   :  { %v3383_v19 = vsel %vm216_vm0, %v3374_v63, 0.0  ;;  %v3384_v38 = vsel %vm216_vm0, %v3375_v18, 0.0  ;;  %v3386_v32 = vsel %vm216_vm0, %v3376_v59, 0.0  ;;  %v3388_v22 = vsel %vm216_vm0, %v3377_v28, 0.0 }
 0x730   :  { %v3385_v30 = vadd.f32 %v3384_v38, %v3383_v19 }
 0x732   :  { %v3387_v49 = vadd.f32 %v3386_v32, %v3385_v30 }
 0x734   :  { %v3389_v57 = vadd.f32 %v3388_v22, %v3387_v49 }
 0x736   :  { %3390 = vadd.xlane.f32.xlu0 %v3389_v57 }
 0x73a   :  { %3381 = vadd.xlane.f32.xlu0 %v3380_v1  ;;  %v6433_v1 = vmov 0.0  }
 0x7bf   :  { %v3391_v42 = vpop.xlane.xlu0 %3390 }
 0x7c0   :  { %v3393_v35 = vmul.f32 0.001953125, %v3391_v42  ;;  %v5080_v42 = vld [vmem:[%s6426_s9 + $0x8] sm:$0xf] }
 0x7c2   :  { %v3397_v47 = vadd.f32 1e-05, %v3393_v35  ;;  %v5087_v35 = vld [vmem:[%s6426_s9 + $0xc] sm:$0xf] }
 0x7c3   :  { %v3382_v43 = vpop.xlane.xlu0 %3381 }
 0x7c4   :  { %5147 = vrsqrt.f32 %v3397_v47  ;;  %v3392_v10 = vmul.f32 0.001953125, %v3382_v43  ;;  %v5094_v47 = vld [vmem:[%s6426_s9 + $0x10] sm:$0xf]  ;;  %v5101_v43 = vld [vmem:[%s6426_s9 + $0x14] sm:$0xf] }
 0x7c6   :  { %v3396_v53 = vadd.f32 1e-05, %v3392_v10  ;;  %v5108_v10 = vld [vmem:[%s6426_s9 + $0x18] sm:$0xf] }
 0x7c8   :  { %5149 = vrsqrt.f32 %v3396_v53  ;;  %v5115_v53 = vld [vmem:[%s6426_s9 + $0x1c] sm:$0xf] }
 0x7d1   :  { %v5148_v50 = vpop.eup %5147 }
 0x7d2   :  { %v3401_v60 = vmul.f32 %v5148_v50, %v3395_v4  ;;  %v5122_v4 = vld [vmem:[%s6426_s9 + $0x20] sm:$0xf] }
 0x7d4   :  { %3409 = vperm.xlu1 %5139, %v3401_v60  }
 0x7d5   :  { %v5150_v16 = vpop.eup %5149 }
 0x7d6   :  { %v3400_v52 = vmul.f32 %v5150_v16, %v3394_v56 }
 0x7d8   :  { %3424 = vperm.xlu1 %5139, %v3420_v41   ;;  %3404 = vperm.xlu0 %5140, %v3400_v52  }
 0x84f   :  { %v3410_v55 = vpop.permute.xlu1 %3409 }
 0x850   :  { %v3416_v23 = vmul.f32 %v3410_v55, %v3366_v31  ;;  %v3417_v61 = vmul.f32 %v3410_v55, %v3367_v44  ;;  %v3418_v2 = vmul.f32 %v3410_v55, %v3368_v46  ;;  %v3419_v17 = vmul.f32 %v3410_v55, %v3369_v0 }
 0x852   :  { %v3436_v3 = vadd.f32 %v3430_v33, %v3416_v23  ;;  %v3437_v63 = vadd.f32 %v3430_v33, %v3417_v61  ;;  %v3438_v18 = vadd.f32 %v3430_v33, %v3418_v2  ;;  %v3439_v59 = vadd.f32 %v3430_v33, %v3419_v17 }
 0x853   :  { %v3405_v28 = vpop.permute.xlu0 %3404  ;;  %v3425_v0 = vpop.permute.xlu1 %3424 }
 0x854   :  { %v6081_v19 = vmax.f32 %v3436_v3, 0.0  ;;  %v6083_v38 = vmax.f32 %v3437_v63, 0.0  ;;  %v6085_v30 = vmax.f32 %v3438_v18, 0.0  ;;  %v6087_v37 = vmax.f32 %v3439_v59, 0.0 }
 0x855   :  { %v3412_v32 = vmul.f32 %v3405_v28, %v6057_v58  ;;  %v3413_v31 = vmul.f32 %v3405_v28, %v6060_v40  ;;  %v3414_v44 = vmul.f32 %v3405_v28, %v3364_v29  ;;  %v3415_v46 = vmul.f32 %v3405_v28, %v3365_v11 }
 0x856   :  { %5067 = vmatprep.subr.msk.mxu0 %vm216_vm0, %v6083_v38  ;;  %5070 = vmatprep.subr.msk.mxu1 %vm216_vm0, %v6087_v37 }
 0x857   :  { %v3432_v49 = vadd.f32 %v3425_v0, %v3412_v32  ;;  %v3433_v45 = vadd.f32 %v3425_v0, %v3413_v31  ;;  %v3434_v22 = vadd.f32 %v3425_v0, %v3414_v44  ;;  %v3435_v57 = vadd.f32 %v3425_v0, %v3415_v46  ;;  %5068 = vmatpush1.msk.msra.mxu0 %vm216_vm0, %v6081_v19 }
 0x858   :  { %5071 = vmatpush1.msk.msra.mxu1 %vm216_vm0, %v6085_v30 }
 0x859   :  { %v6099_v58 = vmax.f32 %v3432_v49, 0.0  ;;  %v6101_v40 = vmax.f32 %v3433_v45, 0.0  ;;  %v6103_v29 = vmax.f32 %v3434_v22, 0.0  ;;  %v6105_v11 = vmax.f32 %v3435_v57, 0.0 }
 0x85b   :  { %3495 = vmatprep.subr.mxu0 %v6101_v40  ;;  %3566 = vmatprep.subr.mxu1 %v6105_v11 }
 0x85c   :  { %3496 = vmatpush1.msra.mxu0 %v6099_v58  ;;  %3567 = vmatpush1.msra.mxu1 %v6103_v29 }
 0x85d   :  { %5069 = vmatmul.mubr.msk.f32.vlgmr.msra.gmra.mxu0 %vm3449_vm8, %v3448_v54  ;;  %5074 = vmatprep.subr.msk.mxu0 %vm216_vm0, %v6083_v38 }
 0x85e   :  { %5077 = vmatprep.subr.msk.mxu1 %vm216_vm0, %v6087_v37  ;;  %5072 = vmatmul.mubr.msk.f32.vlgmr.msra.gmra.mxu1 %vm3449_vm8, %v3448_v54 }
 0x85f   :  { %5075 = vmatpush1.msk.msra.mxu0 %vm216_vm0, %v6081_v19  ;;  %5078 = vmatpush1.msk.msra.mxu1 %vm216_vm0, %v6085_v30 }
 0x860   :  { %3662 = vmatprep.subr.mxu0 %v6101_v40  ;;  %3733 = vmatprep.subr.mxu1 %v6105_v11 }
 0x861   :  { %3663 = vmatpush1.msra.mxu0 %v6099_v58  ;;  %3734 = vmatpush1.msra.mxu1 %v6103_v29 }
 0x862   :  { %3696 = vmatprep.mubr.f32.mxu0 %v6433_v1  ;;  %3767 = vmatprep.mubr.f32.mxu1 %v6433_v1 }
 0x863   :  { %5081 = vmatprep.subr.msk.mxu0 %vm216_vm0, %v6083_v38  ;;  %5084 = vmatprep.subr.msk.mxu1 %vm216_vm0, %v6087_v37 }
 0x864   :  { %5076 = vmatmul.mubr.msk.f32.vlgmr.msra.gmra.mxu0 %vm3449_vm8, %v5073_v26  ;;  %5079 = vmatmul.mubr.msk.f32.vlgmr.msra.gmra.mxu1 %vm3449_vm8, %v5073_v26 }
 0x865   :  { %5082 = vmatpush1.msk.msra.mxu0 %vm216_vm0, %v6081_v19  ;;  %5085 = vmatpush1.msk.msra.mxu1 %vm216_vm0, %v6085_v30 }
 0x866   :  { %3829 = vmatprep.subr.mxu0 %v6101_v40  ;;  %3900 = vmatprep.subr.mxu1 %v6105_v11 }
 0x867   :  { %3830 = vmatpush1.msra.mxu0 %v6099_v58  ;;  %3901 = vmatpush1.msra.mxu1 %v6103_v29 }
 0x868   :  { %3863 = vmatprep.mubr.f32.mxu0 %v6433_v1  ;;  %3934 = vmatprep.mubr.f32.mxu1 %v6433_v1 }
 0x869   :  { %5088 = vmatprep.subr.msk.mxu0 %vm216_vm0, %v6083_v38  ;;  %5091 = vmatprep.subr.msk.mxu1 %vm216_vm0, %v6087_v37 }
 0x86a   :  { %5083 = vmatmul.mubr.msk.f32.vlgmr.msra.gmra.mxu0 %vm3449_vm8, %v5080_v42  ;;  %5086 = vmatmul.mubr.msk.f32.vlgmr.msra.gmra.mxu1 %vm3449_vm8, %v5080_v42 }
 0x86b   :  { %5089 = vmatpush1.msk.msra.mxu0 %vm216_vm0, %v6081_v19  ;;  %5092 = vmatpush1.msk.msra.mxu1 %vm216_vm0, %v6085_v30 }
 0x86c   :  { %3996 = vmatprep.subr.mxu0 %v6101_v40  ;;  %4067 = vmatprep.subr.mxu1 %v6105_v11 }
 0x86d   :  { %3997 = vmatpush1.msra.mxu0 %v6099_v58  ;;  %4068 = vmatpush1.msra.mxu1 %v6103_v29 }
 0x86e   :  { %4030 = vmatprep.mubr.f32.mxu0 %v6433_v1  ;;  %4101 = vmatprep.mubr.f32.mxu1 %v6433_v1 }
 0x86f   :  { %5095 = vmatprep.subr.msk.mxu0 %vm216_vm0, %v6083_v38  ;;  %5098 = vmatprep.subr.msk.mxu1 %vm216_vm0, %v6087_v37 }
 0x870   :  { %5090 = vmatmul.mubr.msk.f32.vlgmr.msra.gmra.mxu0 %vm3449_vm8, %v5087_v35  ;;  %5093 = vmatmul.mubr.msk.f32.vlgmr.msra.gmra.mxu1 %vm3449_vm8, %v5087_v35 }
 0x871   :  { %5096 = vmatpush1.msk.msra.mxu0 %vm216_vm0, %v6081_v19  ;;  %5099 = vmatpush1.msk.msra.mxu1 %vm216_vm0, %v6085_v30 }
 0x872   :  { %4163 = vmatprep.subr.mxu0 %v6101_v40  ;;  %4234 = vmatprep.subr.mxu1 %v6105_v11 }
 0x873   :  { %4164 = vmatpush1.msra.mxu0 %v6099_v58  ;;  %4235 = vmatpush1.msra.mxu1 %v6103_v29 }
 0x874   :  { %4197 = vmatprep.mubr.f32.mxu0 %v6433_v1  ;;  %4268 = vmatprep.mubr.f32.mxu1 %v6433_v1 }
 0x875   :  { %5102 = vmatprep.subr.msk.mxu0 %vm216_vm0, %v6083_v38  ;;  %5105 = vmatprep.subr.msk.mxu1 %vm216_vm0, %v6087_v37 }
 0x876   :  { %5097 = vmatmul.mubr.msk.f32.vlgmr.msra.gmra.mxu0 %vm3449_vm8, %v5094_v47  ;;  %5100 = vmatmul.mubr.msk.f32.vlgmr.msra.gmra.mxu1 %vm3449_vm8, %v5094_v47 }
 0x877   :  { %5103 = vmatpush1.msk.msra.mxu0 %vm216_vm0, %v6081_v19  ;;  %5106 = vmatpush1.msk.msra.mxu1 %vm216_vm0, %v6085_v30 }
 0x878   :  { %4314 = vmatprep.subr.mxu0 %v6101_v40  ;;  %4385 = vmatprep.subr.mxu1 %v6105_v11 }
 0x879   :  { %4315 = vmatpush1.msra.mxu0 %v6099_v58  ;;  %4386 = vmatpush1.msra.mxu1 %v6103_v29 }
 0x87a   :  { %4348 = vmatprep.mubr.f32.mxu0 %v6433_v1  ;;  %4419 = vmatprep.mubr.f32.mxu1 %v6433_v1 }
 0x87b   :  { %5109 = vmatprep.subr.msk.mxu0 %vm216_vm0, %v6083_v38  ;;  %5112 = vmatprep.subr.msk.mxu1 %vm216_vm0, %v6087_v37 }
 0x87c   :  { %5104 = vmatmul.mubr.msk.f32.vlgmr.msra.gmra.mxu0 %vm3449_vm8, %v5101_v43  ;;  %5107 = vmatmul.mubr.msk.f32.vlgmr.msra.gmra.mxu1 %vm3449_vm8, %v5101_v43 }
 0x87d   :  { %5110 = vmatpush1.msk.msra.mxu0 %vm216_vm0, %v6081_v19  ;;  %5113 = vmatpush1.msk.msra.mxu1 %vm216_vm0, %v6085_v30 }
 0x87e   :  { %4481 = vmatprep.subr.mxu0 %v6101_v40  ;;  %4552 = vmatprep.subr.mxu1 %v6105_v11 }
 0x87f   :  { %4482 = vmatpush1.msra.mxu0 %v6099_v58  ;;  %4553 = vmatpush1.msra.mxu1 %v6103_v29 }
 0x880   :  { %4515 = vmatprep.mubr.f32.mxu0 %v6433_v1  ;;  %4586 = vmatprep.mubr.f32.mxu1 %v6433_v1 }
 0x881   :  { %5116 = vmatprep.subr.msk.mxu0 %vm216_vm0, %v6083_v38  ;;  %5119 = vmatprep.subr.msk.mxu1 %vm216_vm0, %v6087_v37 }
 0x882   :  { %5111 = vmatmul.mubr.msk.f32.vlgmr.msra.gmra.mxu0 %vm3449_vm8, %v5108_v10  ;;  %5114 = vmatmul.mubr.msk.f32.vlgmr.msra.gmra.mxu1 %vm3449_vm8, %v5108_v10 }
 0x883   :  { %5117 = vmatpush1.msk.msra.mxu0 %vm216_vm0, %v6081_v19  ;;  %5120 = vmatpush1.msk.msra.mxu1 %vm216_vm0, %v6085_v30 }
 0x884   :  { %4648 = vmatprep.subr.mxu0 %v6101_v40  ;;  %4719 = vmatprep.subr.mxu1 %v6105_v11 }
 0x885   :  { %4649 = vmatpush1.msra.mxu0 %v6099_v58  ;;  %4720 = vmatpush1.msra.mxu1 %v6103_v29 }
 0x886   :  { %4682 = vmatprep.mubr.f32.mxu0 %v6433_v1  ;;  %4753 = vmatprep.mubr.f32.mxu1 %v6433_v1 }
 0x887   :  { %5123 = vmatprep.subr.msk.mxu0 %vm216_vm0, %v6083_v38  ;;  %5126 = vmatprep.subr.msk.mxu1 %vm216_vm0, %v6087_v37 }
 0x888   :  { %5118 = vmatmul.mubr.msk.f32.vlgmr.msra.gmra.mxu0 %vm3449_vm8, %v5115_v53  ;;  %5121 = vmatmul.mubr.msk.f32.vlgmr.msra.gmra.mxu1 %vm3449_vm8, %v5115_v53 }
 0x889   :  { %5124 = vmatpush1.msk.msra.mxu0 %vm216_vm0, %v6081_v19  ;;  %5127 = vmatpush1.msk.msra.mxu1 %vm216_vm0, %v6085_v30 }
 0x88a   :  { %4815 = vmatprep.subr.mxu0 %v6101_v40  ;;  %4886 = vmatprep.subr.mxu1 %v6105_v11 }
 0x88b   :  { %4816 = vmatpush1.msra.mxu0 %v6099_v58  ;;  %4887 = vmatpush1.msra.mxu1 %v6103_v29 }
 0x88c   :  { %4849 = vmatprep.mubr.f32.mxu0 %v6433_v1  ;;  %4920 = vmatprep.mubr.f32.mxu1 %v6433_v1 }
 0x88d   :  { %5125 = vmatmul.mubr.msk.f32.vlgmr.msra.gmra.mxu0 %vm3449_vm8, %v5122_v4  ;;  %5128 = vmatmul.mubr.msk.f32.vlgmr.msra.gmra.mxu1 %vm3449_vm8, %v5122_v4 }
 0x91d   :  { %v3531_v50 = vpop.f32.mrf.mxu0 }
 0x91e   :  { %3607 = vrot.lane.b32.xlu0 %v3531_v50, %s5153_s11  ;;  %v3602_v60 = vpop.f32.mrf.mxu1 }
 0x91f   :  { %v3533_v56 = vpop.f32.mrf.mxu0 }
 0x920   :  { %3609 = vrot.lane.b32.xlu1 %v3533_v56, %s5153_s11  ;;  %v3604_v16 = vpop.f32.mrf.mxu1 }
 0x922   :  { %3611 = vrot.lane.b32.xlu0 %v3602_v60, %s5153_s11 }
 0x924   :  { %3613 = vrot.lane.b32.xlu1 %v3604_v16, %s5153_s11  ;;  %v3698_v41 = vpop.f32.mrf.mxu0  ;;  %v3769_v52 = vpop.f32.mrf.mxu1 }
 0x926   :  { %3774 = vrot.lane.b32.xlu0 %v3698_v41, %s5154_s3  ;;  %v3700_v33 = vpop.f32.mrf.mxu0  ;;  %v3771_v55 = vpop.f32.mrf.mxu1 }
 0x928   :  { %3776 = vrot.lane.b32.xlu1 %v3700_v33, %s5154_s3 }
 0x92a   :  { %3778 = vrot.lane.b32.xlu0 %v3769_v52, %s5154_s3  ;;  %v3865_v23 = vpop.f32.mrf.mxu0  ;;  %v3936_v61 = vpop.f32.mrf.mxu1 }
 0x92c   :  { %3780 = vrot.lane.b32.xlu1 %v3771_v55, %s5154_s3  ;;  %v3867_v2 = vpop.f32.mrf.mxu0  ;;  %v3938_v17 = vpop.f32.mrf.mxu1 }
 0x92e   :  { %3941 = vrot.lane.b32.xlu0 %v3865_v23, %s5155_s12 }
 0x930   :  { %3943 = vrot.lane.b32.xlu1 %v3867_v2, %s5155_s12  ;;  %v4032_v3 = vpop.f32.mrf.mxu0  ;;  %v4103_v63 = vpop.f32.mrf.mxu1 }
 0x932   :  { %3945 = vrot.lane.b32.xlu0 %v3936_v61, %s5155_s12  ;;  %v4034_v18 = vpop.f32.mrf.mxu0  ;;  %v4105_v59 = vpop.f32.mrf.mxu1 }
 0x934   :  { %3947 = vrot.lane.b32.xlu1 %v3938_v17, %s5155_s12 }
 0x936   :  { %4108 = vrot.lane.b32.xlu0 %v4032_v3, %s5156_s13  ;;  %v6281_v28 = vpop.f32.mrf.mxu0  ;;  %v6283_v19 = vpop.f32.mrf.mxu1 }
 0x938   :  { %4110 = vrot.lane.b32.xlu1 %v4034_v18, %s5156_s13  ;;  %v6286_v38 = vpop.f32.mrf.mxu0  ;;  %v6289_v30 = vpop.f32.mrf.mxu1 }
 0x93a   :  { %4112 = vrot.lane.b32.xlu0 %v4103_v63, %s5156_s13 }
 0x93c   :  { %4114 = vrot.lane.b32.xlu1 %v4105_v59, %s5156_s13  ;;  %v4350_v37 = vpop.f32.mrf.mxu0  ;;  %v4421_v31 = vpop.f32.mrf.mxu1 }
 0x93e   :  { %4426 = vrot.lane.b32.xlu0 %v4350_v37, %s5157_s14  ;;  %v4352_v32 = vpop.f32.mrf.mxu0  ;;  %v4423_v44 = vpop.f32.mrf.mxu1 }
 0x940   :  { %4428 = vrot.lane.b32.xlu1 %v4352_v32, %s5157_s14 }
 0x942   :  { %4430 = vrot.lane.b32.xlu0 %v4421_v31, %s5157_s14  ;;  %v4517_v46 = vpop.f32.mrf.mxu0  ;;  %v4588_v49 = vpop.f32.mrf.mxu1 }
 0x944   :  { %4432 = vrot.lane.b32.xlu1 %v4423_v44, %s5157_s14  ;;  %v4519_v0 = vpop.f32.mrf.mxu0  ;;  %v4590_v45 = vpop.f32.mrf.mxu1 }
 0x946   :  { %4593 = vrot.lane.b32.xlu0 %v4517_v46, %s5158_s15 }
 0x948   :  { %4595 = vrot.lane.b32.xlu1 %v4519_v0, %s5158_s15  ;;  %v4684_v22 = vpop.f32.mrf.mxu0  ;;  %v4755_v58 = vpop.f32.mrf.mxu1 }
 0x94a   :  { %4597 = vrot.lane.b32.xlu0 %v4588_v49, %s5158_s15  ;;  %v4686_v57 = vpop.f32.mrf.mxu0  ;;  %v4757_v40 = vpop.f32.mrf.mxu1 }
 0x94c   :  { %4599 = vrot.lane.b32.xlu1 %v4590_v45, %s5158_s15 }
 0x94d   :  { %v4851_v29 = vpop.f32.mrf.mxu0  ;;  %v4922_v54 = vpop.f32.mrf.mxu1 }
 0x94e   :  { %4760 = vrot.lane.b32.xlu0 %v4684_v22, %s5159_s1 }
 0x94f   :  { %v4853_v11 = vpop.f32.mrf.mxu0  ;;  %v4924_v26 = vpop.f32.mrf.mxu1 }
 0x950   :  { %4762 = vrot.lane.b32.xlu1 %v4686_v57, %s5159_s1  ;;  %v6434_v57 = vld [vmem:[#allocation2_spill] sm:$0xff] }
 0x952   :  { %4764 = vrot.lane.b32.xlu0 %v4755_v58, %s5159_s1 }
 0x954   :  { %4766 = vrot.lane.b32.xlu1 %v4757_v40, %s5159_s1 }
 0x956   :  { %4927 = vrot.lane.b32.xlu0 %v4851_v29, %s5160_s2 }
 0x958   :  { %4929 = vrot.lane.b32.xlu1 %v4853_v11, %s5160_s2 }
 0x95a   :  { %4931 = vrot.lane.b32.xlu0 %v4922_v54, %s5160_s2 }
 0x95c   :  { %4933 = vrot.lane.b32.xlu1 %v4924_v26, %s5160_s2 }
 0x990   :  { %v3608_v1 = vpop.permute.xlu0 %3607 }
 0x992   :  { %v3610_v42 = vpop.permute.xlu1 %3609 }
 0x993   :  { %v3617_v3 = vsel %vm440_vm9, %v3608_v1, %v3610_v42 }
 0x994   :  { %v3612_v35 = vpop.permute.xlu0 %3611  ;;  %v3620_v44 = vmul.f32 %v5508_v12, %v3617_v3 }
 0x995   :  { %v3616_v46 = vsel %vm440_vm9, %v3610_v42, %v3612_v35 }
 0x996   :  { %v3614_v47 = vpop.permute.xlu1 %3613 }
 0x997   :  { %v3618_v18 = vsel %vm440_vm9, %v3614_v47, %v3608_v1  ;;  %v3615_v40 = vsel %vm440_vm9, %v3612_v35, %v3614_v47  ;;  %v3621_v35 = vmul.f32 %v3616_v46, %v5512_v13 }
 0x998   :  { %v3775_v43 = vpop.permute.xlu0 %3774  ;;  %v3619_v49 = vmul.f32 %v3618_v18, %v5525_v21 }
 0x99a   :  { %v3777_v10 = vpop.permute.xlu1 %3776 }
 0x99b   :  { %v3784_v29 = vsel %vm608_vm11, %v3775_v43, %v3777_v10 }
 0x99c   :  { %v3779_v53 = vpop.permute.xlu0 %3778 }
 0x99d   :  { %v3783_v37 = vsel %vm608_vm11, %v3777_v10, %v3779_v53  ;;  %v3622_v10 = vmul.f32 %v5521_v20, %v3615_v40 }
 0x99e   :  { %v3781_v4 = vpop.permute.xlu1 %3780  ;;  %v3788_v11 = vmul.f32 %v5487_v5, %v3783_v37 }
 0x99f   :  { %v3785_v17 = vsel %vm608_vm11, %v3781_v4, %v3775_v43  ;;  %v3782_v47 = vsel %vm608_vm11, %v3779_v53, %v3781_v4 }
 0x9a0   :  { %v3942_v50 = vpop.permute.xlu0 %3941  ;;  %v3786_v32 = vmul.f32 %v5494_v7, %v3785_v17  ;;  %v3792_v17 = vadd.f32 %v3788_v11, %v3621_v35  ;;  %v3793_v53 = vadd.f32 %v3782_v47, %v3622_v10 }
 0x9a2   :  { %v3944_v60 = vpop.permute.xlu1 %3943  ;;  %v3790_v54 = vadd.f32 %v3786_v32, %v3619_v49 }
 0x9a3   :  { %v3951_v45 = vsel %vm776_vm14, %v3942_v50, %v3944_v60 }
 0x9a4   :  { %v3946_v56 = vpop.permute.xlu0 %3945  ;;  %v3954_v5 = vmul.f32 %v5540_v25, %v3951_v45 }
 0x9a5   :  { %v3950_v22 = vsel %vm776_vm14, %v3944_v60, %v3946_v56 }
 0x9a6   :  { %v3948_v16 = vpop.permute.xlu1 %3947  ;;  %v3955_v43 = vmul.f32 %v3950_v22, %v5537_v24 }
 0x9a7   :  { %v3952_v59 = vsel %vm776_vm14, %v3948_v16, %v3942_v50  ;;  %v3949_v21 = vsel %vm776_vm14, %v3946_v56, %v3948_v16 }
 0x9a8   :  { %v4109_v41 = vpop.permute.xlu0 %4108  ;;  %v3953_v58 = vmul.f32 %v3952_v59, %v6434_v57  ;;  %v3956_v60 = vmul.f32 %v5548_v27, %v3949_v21  ;;  %v3959_v24 = vadd.f32 %v3955_v43, %v3792_v17 }
 0x9aa   :  { %v4111_v52 = vpop.permute.xlu1 %4110  ;;  %v3957_v56 = vadd.f32 %v3953_v58, %v3790_v54  ;;  %v3960_v46 = vadd.f32 %v3956_v60, %v3793_v53 }
 0x9ab   :  { %v4118_v26 = vsel %vm944_vm15, %v4109_v41, %v4111_v52 }
 0x9ac   :  { %v4113_v33 = vpop.permute.xlu0 %4112  ;;  %v4121_v13 = vmul.f32 %v5508_v12, %v4118_v26 }
 0x9ad   :  { %v4117_v1 = vsel %vm944_vm15, %v4111_v52, %v4113_v33  ;;  %v3791_v52 = vadd.f32 %v3784_v29, %v3620_v44 }
 0x9ae   :  { %v4115_v55 = vpop.permute.xlu1 %4114  ;;  %v4122_v3 = vmul.f32 %v5490_v6, %v4117_v1 }
 0x9af   :  { %v4119_v0 = vsel %vm944_vm15, %v4115_v55, %v4109_v41  ;;  %v4116_v16 = vsel %vm944_vm15, %v4113_v33, %v4115_v55  ;;  %v3958_v59 = vadd.f32 %v3954_v5, %v3791_v52 }
 0x9b0   :  { %v4427_v23 = vpop.permute.xlu0 %4426  ;;  %v4120_v42 = vmul.f32 %v5497_v8, %v4119_v0  ;;  %v4123_v37 = vmul.f32 %v5521_v20, %v4116_v16  ;;  %v4126_v55 = vadd.f32 %v4122_v3, %v3959_v24 }
 0x9b1   :  { %v4125_v33 = vadd.f32 %v4121_v13, %v3958_v59 }
 0x9b2   :  { %v4429_v61 = vpop.permute.xlu1 %4428  ;;  %v4124_v4 = vadd.f32 %v4120_v42, %v3957_v56  ;;  %v4127_v58 = vadd.f32 %v4123_v37, %v3960_v46 }
 0x9b3   :  { %v4436_v32 = vsel %vm1263_vm2, %v4427_v23, %v4429_v61 }
 0x9b4   :  { %v4431_v2 = vpop.permute.xlu0 %4430  ;;  %v4275_v49 = vadd.f32 %v6281_v28, %v4124_v4  ;;  %v4438_v45 = vmul.f32 %v5515_v14, %v4436_v32 }
 0x9b5   :  { %v4435_v44 = vsel %vm1263_vm2, %v4429_v61, %v4431_v2 }
 0x9b6   :  { %v4433_v63 = vpop.permute.xlu1 %4432  ;;  %v4439_v61 = vmul.f32 %v5540_v25, %v4435_v44  ;;  %v4442_v54 = vadd.f32 %v4438_v45, %v4275_v49  ;;  %v4277_v25 = vadd.f32 %v6283_v19, %v4126_v55 }
 0x9b7   :  { %v4434_v20 = vsel %vm1263_vm2, %v4431_v2, %v4433_v63  ;;  %v4437_v22 = vsel %vm1263_vm2, %v4433_v63, %v4427_v23  ;;  %v4276_v2 = vadd.f32 %v6286_v38, %v4125_v33 }
 0x9b8   :  { %v4594_v31 = vpop.permute.xlu0 %4593  ;;  %v4440_v23 = vmul.f32 %v5501_v9, %v4434_v20  ;;  %v4441_v63 = vmul.f32 %v5548_v27, %v4437_v22 }
 0x9ba   :  { %v4596_v7 = vpop.permute.xlu1 %4595  ;;  %v4444_v5 = vadd.f32 %v4440_v23, %v4277_v25 }
 0x9bb   :  { %v4603_v12 = vsel %vm1431_vm4, %v4594_v31, %v4596_v7 }
 0x9bc   :  { %v4598_v50 = vpop.permute.xlu0 %4597  ;;  %v4605_v29 = vmul.f32 %v5497_v8, %v4603_v12 }
 0x9bd   :  { %v4602_v40 = vsel %vm1431_vm4, %v4596_v7, %v4598_v50 }
 0x9be   :  { %v4600_v41 = vpop.permute.xlu1 %4599  ;;  %v4606_v8 = vmul.f32 %v4602_v40, %v5640_v51  ;;  %v4609_v35 = vadd.f32 %v4605_v29, %v4442_v54 }
 0x9bf   :  { %v4601_v28 = vsel %vm1431_vm4, %v4598_v50, %v4600_v41  ;;  %v4604_v11 = vsel %vm1431_vm4, %v4600_v41, %v4594_v31  ;;  %v4278_v31 = vadd.f32 %v6289_v30, %v4127_v58  ;;  %v4443_v50 = vadd.f32 %v4439_v61, %v4276_v2 }
 0x9c0   :  { %v4761_v18 = vpop.permute.xlu0 %4760  ;;  %v4607_v38 = vmul.f32 %v5490_v6, %v4601_v28  ;;  %v4608_v42 = vmul.f32 %v4604_v11, %v5663_v39 }
 0x9c1   :  { %v4445_v51 = vadd.f32 %v4441_v63, %v4278_v31  ;;  %v4610_v30 = vadd.f32 %v4606_v8, %v4443_v50 }
 0x9c2   :  { %v4763_v0 = vpop.permute.xlu1 %4762  ;;  %v4611_v41 = vadd.f32 %v4607_v38, %v4444_v5 }
 0x9c3   :  { %v4770_v27 = vsel %vm1599_vm5, %v4761_v18, %v4763_v0  ;;  %v4612_v16 = vadd.f32 %v4608_v42, %v4445_v51 }
 0x9c4   :  { %v4765_v57 = vpop.permute.xlu0 %4764  ;;  %v4776_v60 = vadd.f32 %v4770_v27, %v4609_v35 }
 0x9c5   :  { %v4769_v7 = vsel %vm1599_vm5, %v4763_v0, %v4765_v57 }
 0x9c6   :  { %v4767_v21 = vpop.permute.xlu1 %4766  ;;  %v4773_v47 = vmul.f32 %v5623_v34, %v4769_v7 }
 0x9c7   :  { %v4771_v26 = vsel %vm1599_vm5, %v4767_v21, %v4761_v18  ;;  %v4768_v6 = vsel %vm1599_vm5, %v4765_v57, %v4767_v21 }
 0x9c8   :  { %v4928_v1 = vpop.permute.xlu0 %4927  ;;  %v4775_v43 = vmul.f32 %v5643_v36, %v4771_v26  ;;  %v4777_v52 = vadd.f32 %v4773_v47, %v4610_v30  ;;  %v4778_v3 = vadd.f32 %v4768_v6, %v4611_v41 }
 0x9ca   :  { %v4930_v19 = vpop.permute.xlu1 %4929  ;;  %v4779_v53 = vadd.f32 %v4775_v43, %v4612_v16 }
 0x9cb   :  { %v4937_v10 = vsel %vm1767_vm6, %v4928_v1, %v4930_v19 }
 0x9cc   :  { %v4939_v39 = vmul.f32 %v5515_v14, %v4937_v10  ;;  %v4932_v56 = vpop.permute.xlu0 %4931 }
 0x9cd   :  { %v4936_v34 = vsel %vm1767_vm6, %v4930_v19, %v4932_v56 }
 0x9ce   :  { %v4943_v17 = vadd.f32 %v4939_v39, %v4776_v60  ;;  %v4940_v36 = vmul.f32 %v4936_v34, %v5680_v15  ;;  %v4934_v13 = vpop.permute.xlu1 %4933 }
 0x9cf   :  { %v4935_v4 = vsel %vm1767_vm6, %v4932_v56, %v4934_v13  ;;  %v4938_v18 = vsel %vm1767_vm6, %v4934_v13, %v4928_v1 }
 0x9d0   :  { %v4951_v14 = vrot.slane %v4943_v17, 4  ;;  %v4944_v59 = vadd.f32 %v4940_v36, %v4777_v52  ;;  %v4941_v24 = vmul.f32 %v5501_v9, %v4935_v4  ;;  %v4942_v37 = vmul.f32 %v4938_v18, %v5699_v62 }
 0x9d2   :  { %4959 = vst [vmem:[%s6417_s10 + $0x20] sm:$0xf0] %v4951_v14  ;;  %v4952_v15 = vrot.slane %v4944_v59, 4  ;;  %v4945_v32 = vadd.f32 %v4941_v24, %v4778_v3  ;;  %v4946_v46 = vadd.f32 %v4942_v37, %v4779_v53 }
 0x9d4   :  { %4960 = vst [vmem:[%s6417_s10 + $0x28] sm:$0xf0] %v4952_v15  ;;  %v4953_v0 = vrot.slane %v4945_v32, 4  ;;  %v4954_v48 = vrot.slane %v4946_v46, 4 }
 0x9d6   :  { %4961 = vst [vmem:[%s6417_s10 + $0x30] sm:$0xf0] %v4953_v0  ;;  %4962 = vst [vmem:[%s6417_s10 + $0x38] sm:$0xf0] %v4954_v48 }

</bundles_post_ra>
